<compile_context>
chip_gen: v7x
topology: tpu7x:2x2x1
jax: 0.10.0
libtpu: 0.0.40
codegen_flags: <defaults>
</compile_context>

<pallas_src>
import jax
import jax.numpy as jnp
from jax.experimental import pallas as pl
from jax.experimental.pallas import tpu as pltpu

HIDDEN = 128          # hidden_size (module default)
HEADS = 4             # num_heads
HEAD_DIM = HIDDEN // HEADS
EPS = 1e-5            # PyTorch LayerNorm default eps


def transformer_block_kernel(x_ref,
                             n1w, n1b,
                             wqkv_t, bqkv,
                             wo_t, bo,
                             n2w, n2b,
                             w1_t, b1,
                             lnw, lnb,
                             w2_t, b2,
                             o_ref):
    Bt, S, E = x_ref.shape
    M = Bt * S
    x = x_ref[...].reshape(M, E)                      # (M, E) f32, M = Bt*S rows

    def layernorm(v, w_ref, b_ref):
        # two-pass variance (E[(x-mu)^2]); avoids cancellation after residuals
        mu = jnp.mean(v, axis=-1, keepdims=True)
        d = v - mu
        var = jnp.mean(d * d, axis=-1, keepdims=True)
        return d * jax.lax.rsqrt(var + EPS) * w_ref[0] + b_ref[0]

    # ---- norm1 + fused QKV projection (bf16 operands, f32 accumulation) ----
    # NOTE: wqkv_t / bqkv already carry the 1/sqrt(HEAD_DIM) scale on the Q block.
    nx = layernorm(x, n1w, n1b)
    qkv = jnp.dot(nx.astype(jnp.bfloat16), wqkv_t[...],
                  preferred_element_type=jnp.float32) + bqkv[0]       # (M, 3E) f32
    qkv_bf = qkv.astype(jnp.bfloat16).reshape(Bt, S, 3 * E)           # one full-width cast

    # ---- multihead attention, batched over the folded batch dim ----
    head_outs = []
    for h in range(HEADS):
        lo = h * HEAD_DIM
        qh = qkv_bf[:, :, lo:lo + HEAD_DIM]                           # (Bt, S, Dh) bf16
        kh = qkv_bf[:, :, E + lo:E + lo + HEAD_DIM]
        vh = qkv_bf[:, :, 2 * E + lo:2 * E + lo + HEAD_DIM]
        s = jnp.einsum('bqd,bkd->bqk', qh, kh,
                       preferred_element_type=jnp.float32)            # (Bt, S, S) f32
        s = s - jnp.max(s, axis=-1, keepdims=True)
        e = jnp.exp(s)
        p = e * pl.reciprocal(jnp.sum(e, axis=-1, keepdims=True), approx=True)
        head_outs.append(jnp.einsum('bqk,bkd->bqd', p.astype(jnp.bfloat16), vh,
                                    preferred_element_type=jnp.float32))
    attn = jnp.concatenate(head_outs, axis=-1).reshape(M, E)          # (M, E) f32
    attn = jnp.dot(attn.astype(jnp.bfloat16), wo_t[...],
                   preferred_element_type=jnp.float32) + bo[0]

    # ---- residual 1 ----
    x1 = attn + x

    # ---- norm2 + MLP: Linear(E,2E) -> LayerNorm(2E) -> ELU -> Linear(2E,E) ----
    nx2 = layernorm(x1, n2w, n2b)
    hid = jnp.dot(nx2.astype(jnp.bfloat16), w1_t[...],
                  preferred_element_type=jnp.float32) + b1[0]
    hid = layernorm(hid, lnw, lnb)
    # ELU(alpha=1); clamp the exp argument so the unselected branch never hits inf.
    hid = jnp.where(hid > 0, hid, jnp.exp(jnp.minimum(hid, 0.0)) - 1.0)
    hid = jnp.dot(hid.astype(jnp.bfloat16), w2_t[...],
                  preferred_element_type=jnp.float32) + b2[0]

    # ---- residual 2 ----
    o_ref[...] = (x1 + hid).reshape(Bt, S, E)


def _pick_block_b(B, S, target_rows=1024, cap=256):
    """Largest divisor of B giving block_b*S near target_rows, with >=2 grid steps."""
    bt = max(1, min(B, cap, max(1, target_rows // S)))
    if B >= 2:
        bt = min(bt, B // 2)   # keep at least 2 grid steps (both v7x TensorCores busy)
    bt = max(1, bt)
    while B % bt:
        bt -= 1
    return bt


def _vmem_limit_bytes(block_b, S, E):
    """Rough per-step VMEM footprint with double-buffered tiles + f32 intermediates."""
    M = block_b * S
    tile = block_b * S * E * 4
    io = 2 * 2 * tile                                        # in + out, double-buffered
    weights = 2 * 2 * (3 * E * E + E * E + 2 * E * E + 2 * E * E)   # bf16, double-buffered
    inter = 16 * M * E * 4 + 4 * block_b * S * S * 4          # qkv/hid/x1/... + softmax
    est = io + weights + inter + (4 << 20)
    return int(min(max(est, 32 << 20), 100 << 20))


def prepare_params(params):
    """One-time weight prep: fold 1/sqrt(Dh) into the Q block, cast matmul weights to bf16."""
    E = params["wqkv_t"].shape[0]
    scale = 1.0 / (HEAD_DIM ** 0.5)
    wqkv_t = params["wqkv_t"].at[:, :E].multiply(scale)
    bqkv = params["bqkv"].at[:, :E].multiply(scale)
    return [
        params["n1w"], params["n1b"],
        wqkv_t.astype(jnp.bfloat16), bqkv,
        params["wo_t"].astype(jnp.bfloat16), params["bo"],
        params["n2w"], params["n2b"],
        params["w1_t"].astype(jnp.bfloat16), params["b1"],
        params["lnw"], params["lnb"],
        params["w2_t"].astype(jnp.bfloat16), params["b2"],
    ]


def transformer_block(x, prepared_weights, block_b=None):
    B, S, E = x.shape
    if block_b is None:
        block_b = _pick_block_b(B, S)

    weight_list = prepared_weights

    in_specs = [pl.BlockSpec((block_b, S, E), lambda b: (b, 0, 0))]
    in_specs += [pl.BlockSpec(w.shape, lambda b: (0, 0)) for w in weight_list]

    Mtot = B * S
    proj_flops = 2 * Mtot * E * (3 * E + E + 2 * E + 2 * E)   # qkv, out-proj, mlp1, mlp2
    attn_flops = 4 * B * HEADS * S * S * HEAD_DIM             # scores + PV
    cost = pl.CostEstimate(
        flops=proj_flops + attn_flops,
        transcendentals=B * HEADS * S * S + 2 * Mtot * E + 3 * Mtot,
        bytes_accessed=2 * Mtot * E * 4
        + sum(int(w.size) * w.dtype.itemsize for w in weight_list),
    )

    return pl.pallas_call(
        transformer_block_kernel,
        out_shape=jax.ShapeDtypeStruct((B, S, E), jnp.float32),
        grid=(B // block_b,),
        in_specs=in_specs,
        out_specs=pl.BlockSpec((block_b, S, E), lambda b: (b, 0, 0)),
        compiler_params=pltpu.CompilerParams(
            dimension_semantics=("parallel",),
            vmem_limit_bytes=_vmem_limit_bytes(block_b, S, E)),
        cost_estimate=cost,
    )(x, *weight_list)


def init_params(key, E=HIDDEN):
    ks = jax.random.split(key, 16)
    n = lambda k, shape, s=0.02: s * jax.random.normal(k, shape, jnp.float32)
    params = {
        # LayerNorm 1
        "n1w": 1.0 + n(ks[0], (1, E), 0.01),
        "n1b": n(ks[1], (1, E), 0.01),
        # MultiheadAttention in-proj (stored transposed: (E, 3E)) and bias
        "wqkv_t": n(ks[2], (E, 3 * E)),
        "bqkv": n(ks[3], (1, 3 * E), 0.01),
        # out-proj (transposed: (E, E)) and bias
        "wo_t": n(ks[4], (E, E)),
        "bo": n(ks[5], (1, E), 0.01),
        # LayerNorm 2
        "n2w": 1.0 + n(ks[6], (1, E), 0.01),
        "n2b": n(ks[7], (1, E), 0.01),
        # MLP Linear(E, 2E) transposed
        "w1_t": n(ks[8], (E, 2 * E)),
        "b1": n(ks[9], (1, 2 * E), 0.01),
        # MLP LayerNorm(2E)
        "lnw": 1.0 + n(ks[10], (1, 2 * E), 0.01),
        "lnb": n(ks[11], (1, 2 * E), 0.01),
        # MLP Linear(2E, E) transposed
        "w2_t": n(ks[12], (2 * E, E)),
        "b2": n(ks[13], (1, E), 0.01),
    }
    return params


def reference_jax(x, p):
    """Pure-JAX f32 reference reproducing the PyTorch forward (eval mode)."""
    def ln(v, w, b):
        mu = jnp.mean(v, axis=-1, keepdims=True)
        var = jnp.mean((v - mu) ** 2, axis=-1, keepdims=True)
        return (v - mu) / jnp.sqrt(var + EPS) * w[0] + b[0]

    nx = ln(x, p["n1w"], p["n1b"])
    qkv = nx @ p["wqkv_t"] + p["bqkv"][0]
    q, k, v = jnp.split(qkv, 3, axis=-1)
    B, S, E = x.shape
    q = q.reshape(B, S, HEADS, HEAD_DIM).transpose(0, 2, 1, 3) / (HEAD_DIM ** 0.5)
    k = k.reshape(B, S, HEADS, HEAD_DIM).transpose(0, 2, 1, 3)
    v = v.reshape(B, S, HEADS, HEAD_DIM).transpose(0, 2, 1, 3)
    scores = jnp.einsum("bhqd,bhkd->bhqk", q, k)
    p_attn = jax.nn.softmax(scores, axis=-1)
    out = jnp.einsum("bhqk,bhkd->bhqd", p_attn, v)
    out = out.transpose(0, 2, 1, 3).reshape(B, S, E)
    out = out @ p["wo_t"] + p["bo"][0]
    x1 = out + x
    nx2 = ln(x1, p["n2w"], p["n2b"])
    h = nx2 @ p["w1_t"] + p["b1"][0]
    h = ln(h, p["lnw"], p["lnb"])
    h = jnp.where(h > 0, h, jnp.exp(jnp.minimum(h, 0.0)) - 1.0)
    h = h @ p["w2_t"] + p["b2"][0]
    return x1 + h


if __name__ == "__main__":
    key = jax.random.PRNGKey(0)
    kx, kp = jax.random.split(key)

    B, S, E = 2, 8, HIDDEN
    x = jax.random.normal(kx, (B, S, E), jnp.float32)
    params = init_params(kp, E)
    prepared = prepare_params(params)        # one-time: scale-fold + bf16 cast

    out = transformer_block(x, prepared)
    out = jax.block_until_ready(out)

    ref = reference_jax(x, params)
    assert out.shape == (B, S, E)
    # bf16 matmul operands (f32 accumulation) -> slightly looser tolerance vs f32 ref.
    assert jnp.allclose(out, ref, atol=3e-2, rtol=3e-2), "mismatch vs JAX reference"

    print("KERNEL_OK")
</pallas_src>

<mosaic_0001>
module attributes {stable_mosaic.version = 11 : i64} {
  func.func @transformer_block_kernel(%arg0: i32, %arg1: memref<1x8x128xf32, #tpu.memory_space<vmem>>, %arg2: memref<1x128xf32, #tpu.memory_space<vmem>>, %arg3: memref<1x128xf32, #tpu.memory_space<vmem>>, %arg4: memref<128x384xbf16, #tpu.memory_space<vmem>>, %arg5: memref<1x384xf32, #tpu.memory_space<vmem>>, %arg6: memref<128x128xbf16, #tpu.memory_space<vmem>>, %arg7: memref<1x128xf32, #tpu.memory_space<vmem>>, %arg8: memref<1x128xf32, #tpu.memory_space<vmem>>, %arg9: memref<1x128xf32, #tpu.memory_space<vmem>>, %arg10: memref<128x256xbf16, #tpu.memory_space<vmem>>, %arg11: memref<1x256xf32, #tpu.memory_space<vmem>>, %arg12: memref<1x256xf32, #tpu.memory_space<vmem>>, %arg13: memref<1x256xf32, #tpu.memory_space<vmem>>, %arg14: memref<256x128xbf16, #tpu.memory_space<vmem>>, %arg15: memref<1x128xf32, #tpu.memory_space<vmem>>, %arg16: memref<1x8x128xf32, #tpu.memory_space<vmem>>) attributes {dimension_semantics = [#tpu.dimension_semantics<parallel>], iteration_bounds = array<i64: 2>, scalar_prefetch = 0 : i64, scratch_operands = 0 : i64, tpu.core_type = #tpu.core_type<tc>, window_params = [{transform_indices = @transform_0, window_bounds = array<i64: 1, 8, 128>}, {pipeline_mode = #tpu.pipeline_mode<synchronous>, transform_indices = @transform_1, window_bounds = array<i64: 1, 128>}, {pipeline_mode = #tpu.pipeline_mode<synchronous>, transform_indices = @transform_2, window_bounds = array<i64: 1, 128>}, {pipeline_mode = #tpu.pipeline_mode<synchronous>, transform_indices = @transform_3, window_bounds = array<i64: 128, 384>}, {pipeline_mode = #tpu.pipeline_mode<synchronous>, transform_indices = @transform_4, window_bounds = array<i64: 1, 384>}, {pipeline_mode = #tpu.pipeline_mode<synchronous>, transform_indices = @transform_5, window_bounds = array<i64: 128, 128>}, {pipeline_mode = #tpu.pipeline_mode<synchronous>, transform_indices = @transform_6, window_bounds = array<i64: 1, 128>}, {pipeline_mode = #tpu.pipeline_mode<synchronous>, transform_indices = @transform_7, window_bounds = array<i64: 1, 128>}, {pipeline_mode = #tpu.pipeline_mode<synchronous>, transform_indices = @transform_8, window_bounds = array<i64: 1, 128>}, {pipeline_mode = #tpu.pipeline_mode<synchronous>, transform_indices = @transform_9, window_bounds = array<i64: 128, 256>}, {pipeline_mode = #tpu.pipeline_mode<synchronous>, transform_indices = @transform_10, window_bounds = array<i64: 1, 256>}, {pipeline_mode = #tpu.pipeline_mode<synchronous>, transform_indices = @transform_11, window_bounds = array<i64: 1, 256>}, {pipeline_mode = #tpu.pipeline_mode<synchronous>, transform_indices = @transform_12, window_bounds = array<i64: 1, 256>}, {pipeline_mode = #tpu.pipeline_mode<synchronous>, transform_indices = @transform_13, window_bounds = array<i64: 256, 128>}, {pipeline_mode = #tpu.pipeline_mode<synchronous>, transform_indices = @transform_14, window_bounds = array<i64: 1, 128>}, {transform_indices = @transform_15, window_bounds = array<i64: 1, 8, 128>}]} {
    %c0 = arith.constant 0 : index
    %c0_0 = arith.constant 0 : index
    %c0_1 = arith.constant 0 : index
    %0 = vector.load %arg1[%c0, %c0_0, %c0_1] : memref<1x8x128xf32, #tpu.memory_space<vmem>>, vector<1x8x128xf32>
    %1 = vector.shape_cast %0 : vector<1x8x128xf32> to vector<8x128xf32>
    %cst = arith.constant dense<0.000000e+00> : vector<8xf32>
    %2 = vector.multi_reduction <add>, %1, %cst [1] : vector<8x128xf32> to vector<8xf32>
    %3 = vector.shape_cast %2 : vector<8xf32> to vector<8x1xf32>
    %cst_2 = arith.constant 1.280000e+02 : f32
    %4 = vector.broadcast %cst_2 : f32 to vector<8x1xf32>
    %5 = arith.divf %3, %4 : vector<8x1xf32>
    %6 = vector.broadcast %5 : vector<8x1xf32> to vector<8x128xf32>
    %7 = arith.subf %1, %6 : vector<8x128xf32>
    %8 = arith.mulf %7, %7 : vector<8x128xf32>
    %cst_3 = arith.constant dense<0.000000e+00> : vector<8xf32>
    %9 = vector.multi_reduction <add>, %8, %cst_3 [1] : vector<8x128xf32> to vector<8xf32>
    %10 = vector.shape_cast %9 : vector<8xf32> to vector<8x1xf32>
    %cst_4 = arith.constant 1.280000e+02 : f32
    %11 = vector.broadcast %cst_4 : f32 to vector<8x1xf32>
    %12 = arith.divf %10, %11 : vector<8x1xf32>
    %cst_5 = arith.constant 9.99999974E-6 : f32
    %13 = vector.broadcast %cst_5 : f32 to vector<8x1xf32>
    %14 = arith.addf %12, %13 : vector<8x1xf32>
    %15 = math.rsqrt %14 : vector<8x1xf32>
    %16 = vector.broadcast %15 : vector<8x1xf32> to vector<8x128xf32>
    %17 = arith.mulf %7, %16 : vector<8x128xf32>
    %c0_6 = arith.constant 0 : index
    %c0_7 = arith.constant 0 : index
    %18 = vector.load %arg2[%c0_6, %c0_7] : memref<1x128xf32, #tpu.memory_space<vmem>>, vector<1x128xf32>
    %19 = vector.shape_cast %18 : vector<1x128xf32> to vector<128xf32>
    %20 = vector.shape_cast %19 : vector<128xf32> to vector<1x128xf32>
    %21 = vector.broadcast %20 : vector<1x128xf32> to vector<8x128xf32>
    %22 = arith.mulf %17, %21 : vector<8x128xf32>
    %c0_8 = arith.constant 0 : index
    %c0_9 = arith.constant 0 : index
    %23 = vector.load %arg3[%c0_8, %c0_9] : memref<1x128xf32, #tpu.memory_space<vmem>>, vector<1x128xf32>
    %24 = vector.shape_cast %23 : vector<1x128xf32> to vector<128xf32>
    %25 = vector.shape_cast %24 : vector<128xf32> to vector<1x128xf32>
    %26 = vector.broadcast %25 : vector<1x128xf32> to vector<8x128xf32>
    %27 = arith.addf %22, %26 : vector<8x128xf32>
    %28 = arith.truncf %27 : vector<8x128xf32> to vector<8x128xbf16>
    %c0_10 = arith.constant 0 : index
    %c0_11 = arith.constant 0 : index
    %29 = vector.load %arg4[%c0_10, %c0_11] : memref<128x384xbf16, #tpu.memory_space<vmem>>, vector<128x384xbf16>
    %cst_12 = arith.constant dense<0.000000e+00> : vector<8x384xf32>
    %30 = tpu.matmul %28, %29, %cst_12 {dimension_numbers = #tpu.dot_dimension_numbers<[1], [0], [0], [1], [0, 0, 1, 1], [], []>} : vector<8x128xbf16>, vector<128x384xbf16>, vector<8x384xf32> -> vector<8x384xf32>
    %c0_13 = arith.constant 0 : index
    %c0_14 = arith.constant 0 : index
    %31 = vector.load %arg5[%c0_13, %c0_14] : memref<1x384xf32, #tpu.memory_space<vmem>>, vector<1x384xf32>
    %32 = vector.shape_cast %31 : vector<1x384xf32> to vector<384xf32>
    %33 = vector.shape_cast %32 : vector<384xf32> to vector<1x384xf32>
    %34 = vector.broadcast %33 : vector<1x384xf32> to vector<8x384xf32>
    %35 = arith.addf %30, %34 : vector<8x384xf32>
    %36 = arith.truncf %35 : vector<8x384xf32> to vector<8x384xbf16>
    %37 = vector.shape_cast %36 : vector<8x384xbf16> to vector<1x8x384xbf16>
    %38 = vector.extract_strided_slice %37 {offsets = [0, 0, 0], sizes = [1, 8, 32], strides = [1, 1, 1]} : vector<1x8x384xbf16> to vector<1x8x32xbf16>
    %39 = vector.extract_strided_slice %37 {offsets = [0, 0, 128], sizes = [1, 8, 32], strides = [1, 1, 1]} : vector<1x8x384xbf16> to vector<1x8x32xbf16>
    %40 = vector.extract_strided_slice %37 {offsets = [0, 0, 256], sizes = [1, 8, 32], strides = [1, 1, 1]} : vector<1x8x384xbf16> to vector<1x8x32xbf16>
    "tpu.trace_start"() <{level = 10 : i32, message = "bqd,bkd->bqk"}> : () -> ()
    %cst_15 = arith.constant dense<0.000000e+00> : vector<1x8x8xf32>
    %41 = tpu.matmul %38, %39, %cst_15 {dimension_numbers = #tpu.dot_dimension_numbers<[2], [2], [1], [1], [0, 0, 0, 1, 1, 1], [0], [0]>} : vector<1x8x32xbf16>, vector<1x8x32xbf16>, vector<1x8x8xf32> -> vector<1x8x8xf32>
    "tpu.trace_stop"() : () -> ()
    %cst_16 = arith.constant dense<0xFF800000> : vector<1x8xf32>
    %42 = vector.multi_reduction <maximumf>, %41, %cst_16 [2] : vector<1x8x8xf32> to vector<1x8xf32>
    %43 = vector.shape_cast %42 : vector<1x8xf32> to vector<1x8x1xf32>
    %44 = vector.broadcast %43 : vector<1x8x1xf32> to vector<1x8x8xf32>
    %45 = arith.subf %41, %44 : vector<1x8x8xf32>
    %46 = math.exp %45 : vector<1x8x8xf32>
    %cst_17 = arith.constant dense<0.000000e+00> : vector<1x8xf32>
    %47 = vector.multi_reduction <add>, %46, %cst_17 [2] : vector<1x8x8xf32> to vector<1x8xf32>
    %48 = vector.shape_cast %47 : vector<1x8xf32> to vector<1x8x1xf32>
    %49 = tpu.reciprocal %48 {approx = true} : vector<1x8x1xf32> -> vector<1x8x1xf32>
    %50 = vector.broadcast %49 : vector<1x8x1xf32> to vector<1x8x8xf32>
    %51 = arith.mulf %46, %50 : vector<1x8x8xf32>
    %52 = arith.truncf %51 : vector<1x8x8xf32> to vector<1x8x8xbf16>
    "tpu.trace_start"() <{level = 10 : i32, message = "bqk,bkd->bqd"}> : () -> ()
    %cst_18 = arith.constant dense<0.000000e+00> : vector<1x8x32xf32>
    %53 = tpu.matmul %52, %40, %cst_18 {dimension_numbers = #tpu.dot_dimension_numbers<[2], [1], [1], [2], [0, 0, 0, 1, 1, 2], [0], [0]>} : vector<1x8x8xbf16>, vector<1x8x32xbf16>, vector<1x8x32xf32> -> vector<1x8x32xf32>
    "tpu.trace_stop"() : () -> ()
    %54 = vector.extract_strided_slice %37 {offsets = [0, 0, 32], sizes = [1, 8, 32], strides = [1, 1, 1]} : vector<1x8x384xbf16> to vector<1x8x32xbf16>
    %55 = vector.extract_strided_slice %37 {offsets = [0, 0, 160], sizes = [1, 8, 32], strides = [1, 1, 1]} : vector<1x8x384xbf16> to vector<1x8x32xbf16>
    %56 = vector.extract_strided_slice %37 {offsets = [0, 0, 288], sizes = [1, 8, 32], strides = [1, 1, 1]} : vector<1x8x384xbf16> to vector<1x8x32xbf16>
    "tpu.trace_start"() <{level = 10 : i32, message = "bqd,bkd->bqk"}> : () -> ()
    %cst_19 = arith.constant dense<0.000000e+00> : vector<1x8x8xf32>
    %57 = tpu.matmul %54, %55, %cst_19 {dimension_numbers = #tpu.dot_dimension_numbers<[2], [2], [1], [1], [0, 0, 0, 1, 1, 1], [0], [0]>} : vector<1x8x32xbf16>, vector<1x8x32xbf16>, vector<1x8x8xf32> -> vector<1x8x8xf32>
    "tpu.trace_stop"() : () -> ()
    %cst_20 = arith.constant dense<0xFF800000> : vector<1x8xf32>
    %58 = vector.multi_reduction <maximumf>, %57, %cst_20 [2] : vector<1x8x8xf32> to vector<1x8xf32>
    %59 = vector.shape_cast %58 : vector<1x8xf32> to vector<1x8x1xf32>
    %60 = vector.broadcast %59 : vector<1x8x1xf32> to vector<1x8x8xf32>
    %61 = arith.subf %57, %60 : vector<1x8x8xf32>
    %62 = math.exp %61 : vector<1x8x8xf32>
    %cst_21 = arith.constant dense<0.000000e+00> : vector<1x8xf32>
    %63 = vector.multi_reduction <add>, %62, %cst_21 [2] : vector<1x8x8xf32> to vector<1x8xf32>
    %64 = vector.shape_cast %63 : vector<1x8xf32> to vector<1x8x1xf32>
    %65 = tpu.reciprocal %64 {approx = true} : vector<1x8x1xf32> -> vector<1x8x1xf32>
    %66 = vector.broadcast %65 : vector<1x8x1xf32> to vector<1x8x8xf32>
    %67 = arith.mulf %62, %66 : vector<1x8x8xf32>
    %68 = arith.truncf %67 : vector<1x8x8xf32> to vector<1x8x8xbf16>
    "tpu.trace_start"() <{level = 10 : i32, message = "bqk,bkd->bqd"}> : () -> ()
    %cst_22 = arith.constant dense<0.000000e+00> : vector<1x8x32xf32>
    %69 = tpu.matmul %68, %56, %cst_22 {dimension_numbers = #tpu.dot_dimension_numbers<[2], [1], [1], [2], [0, 0, 0, 1, 1, 2], [0], [0]>} : vector<1x8x8xbf16>, vector<1x8x32xbf16>, vector<1x8x32xf32> -> vector<1x8x32xf32>
    "tpu.trace_stop"() : () -> ()
    %70 = vector.extract_strided_slice %37 {offsets = [0, 0, 64], sizes = [1, 8, 32], strides = [1, 1, 1]} : vector<1x8x384xbf16> to vector<1x8x32xbf16>
    %71 = vector.extract_strided_slice %37 {offsets = [0, 0, 192], sizes = [1, 8, 32], strides = [1, 1, 1]} : vector<1x8x384xbf16> to vector<1x8x32xbf16>
    %72 = vector.extract_strided_slice %37 {offsets = [0, 0, 320], sizes = [1, 8, 32], strides = [1, 1, 1]} : vector<1x8x384xbf16> to vector<1x8x32xbf16>
    "tpu.trace_start"() <{level = 10 : i32, message = "bqd,bkd->bqk"}> : () -> ()
    %cst_23 = arith.constant dense<0.000000e+00> : vector<1x8x8xf32>
    %73 = tpu.matmul %70, %71, %cst_23 {dimension_numbers = #tpu.dot_dimension_numbers<[2], [2], [1], [1], [0, 0, 0, 1, 1, 1], [0], [0]>} : vector<1x8x32xbf16>, vector<1x8x32xbf16>, vector<1x8x8xf32> -> vector<1x8x8xf32>
    "tpu.trace_stop"() : () -> ()
    %cst_24 = arith.constant dense<0xFF800000> : vector<1x8xf32>
    %74 = vector.multi_reduction <maximumf>, %73, %cst_24 [2] : vector<1x8x8xf32> to vector<1x8xf32>
    %75 = vector.shape_cast %74 : vector<1x8xf32> to vector<1x8x1xf32>
    %76 = vector.broadcast %75 : vector<1x8x1xf32> to vector<1x8x8xf32>
    %77 = arith.subf %73, %76 : vector<1x8x8xf32>
    %78 = math.exp %77 : vector<1x8x8xf32>
    %cst_25 = arith.constant dense<0.000000e+00> : vector<1x8xf32>
    %79 = vector.multi_reduction <add>, %78, %cst_25 [2] : vector<1x8x8xf32> to vector<1x8xf32>
    %80 = vector.shape_cast %79 : vector<1x8xf32> to vector<1x8x1xf32>
    %81 = tpu.reciprocal %80 {approx = true} : vector<1x8x1xf32> -> vector<1x8x1xf32>
    %82 = vector.broadcast %81 : vector<1x8x1xf32> to vector<1x8x8xf32>
    %83 = arith.mulf %78, %82 : vector<1x8x8xf32>
    %84 = arith.truncf %83 : vector<1x8x8xf32> to vector<1x8x8xbf16>
    "tpu.trace_start"() <{level = 10 : i32, message = "bqk,bkd->bqd"}> : () -> ()
    %cst_26 = arith.constant dense<0.000000e+00> : vector<1x8x32xf32>
    %85 = tpu.matmul %84, %72, %cst_26 {dimension_numbers = #tpu.dot_dimension_numbers<[2], [1], [1], [2], [0, 0, 0, 1, 1, 2], [0], [0]>} : vector<1x8x8xbf16>, vector<1x8x32xbf16>, vector<1x8x32xf32> -> vector<1x8x32xf32>
    "tpu.trace_stop"() : () -> ()
    %86 = vector.extract_strided_slice %37 {offsets = [0, 0, 96], sizes = [1, 8, 32], strides = [1, 1, 1]} : vector<1x8x384xbf16> to vector<1x8x32xbf16>
    %87 = vector.extract_strided_slice %37 {offsets = [0, 0, 224], sizes = [1, 8, 32], strides = [1, 1, 1]} : vector<1x8x384xbf16> to vector<1x8x32xbf16>
    %88 = vector.extract_strided_slice %37 {offsets = [0, 0, 352], sizes = [1, 8, 32], strides = [1, 1, 1]} : vector<1x8x384xbf16> to vector<1x8x32xbf16>
    "tpu.trace_start"() <{level = 10 : i32, message = "bqd,bkd->bqk"}> : () -> ()
    %cst_27 = arith.constant dense<0.000000e+00> : vector<1x8x8xf32>
    %89 = tpu.matmul %86, %87, %cst_27 {dimension_numbers = #tpu.dot_dimension_numbers<[2], [2], [1], [1], [0, 0, 0, 1, 1, 1], [0], [0]>} : vector<1x8x32xbf16>, vector<1x8x32xbf16>, vector<1x8x8xf32> -> vector<1x8x8xf32>
    "tpu.trace_stop"() : () -> ()
    %cst_28 = arith.constant dense<0xFF800000> : vector<1x8xf32>
    %90 = vector.multi_reduction <maximumf>, %89, %cst_28 [2] : vector<1x8x8xf32> to vector<1x8xf32>
    %91 = vector.shape_cast %90 : vector<1x8xf32> to vector<1x8x1xf32>
    %92 = vector.broadcast %91 : vector<1x8x1xf32> to vector<1x8x8xf32>
    %93 = arith.subf %89, %92 : vector<1x8x8xf32>
    %94 = math.exp %93 : vector<1x8x8xf32>
    %cst_29 = arith.constant dense<0.000000e+00> : vector<1x8xf32>
    %95 = vector.multi_reduction <add>, %94, %cst_29 [2] : vector<1x8x8xf32> to vector<1x8xf32>
    %96 = vector.shape_cast %95 : vector<1x8xf32> to vector<1x8x1xf32>
    %97 = tpu.reciprocal %96 {approx = true} : vector<1x8x1xf32> -> vector<1x8x1xf32>
    %98 = vector.broadcast %97 : vector<1x8x1xf32> to vector<1x8x8xf32>
    %99 = arith.mulf %94, %98 : vector<1x8x8xf32>
    %100 = arith.truncf %99 : vector<1x8x8xf32> to vector<1x8x8xbf16>
    "tpu.trace_start"() <{level = 10 : i32, message = "bqk,bkd->bqd"}> : () -> ()
    %cst_30 = arith.constant dense<0.000000e+00> : vector<1x8x32xf32>
    %101 = tpu.matmul %100, %88, %cst_30 {dimension_numbers = #tpu.dot_dimension_numbers<[2], [1], [1], [2], [0, 0, 0, 1, 1, 2], [0], [0]>} : vector<1x8x8xbf16>, vector<1x8x32xbf16>, vector<1x8x32xf32> -> vector<1x8x32xf32>
    "tpu.trace_stop"() : () -> ()
    %102 = tpu.concatenate %53, %69, %85, %101 in 2 : vector<1x8x32xf32>, vector<1x8x32xf32>, vector<1x8x32xf32>, vector<1x8x32xf32> -> vector<1x8x128xf32>
    %103 = vector.shape_cast %102 : vector<1x8x128xf32> to vector<8x128xf32>
    %104 = arith.truncf %103 : vector<8x128xf32> to vector<8x128xbf16>
    %c0_31 = arith.constant 0 : index
    %c0_32 = arith.constant 0 : index
    %105 = vector.load %arg6[%c0_31, %c0_32] : memref<128x128xbf16, #tpu.memory_space<vmem>>, vector<128x128xbf16>
    %cst_33 = arith.constant dense<0.000000e+00> : vector<8x128xf32>
    %106 = tpu.matmul %104, %105, %cst_33 {dimension_numbers = #tpu.dot_dimension_numbers<[1], [0], [0], [1], [0, 0, 1, 1], [], []>} : vector<8x128xbf16>, vector<128x128xbf16>, vector<8x128xf32> -> vector<8x128xf32>
    %c0_34 = arith.constant 0 : index
    %c0_35 = arith.constant 0 : index
    %107 = vector.load %arg7[%c0_34, %c0_35] : memref<1x128xf32, #tpu.memory_space<vmem>>, vector<1x128xf32>
    %108 = vector.shape_cast %107 : vector<1x128xf32> to vector<128xf32>
    %109 = vector.shape_cast %108 : vector<128xf32> to vector<1x128xf32>
    %110 = vector.broadcast %109 : vector<1x128xf32> to vector<8x128xf32>
    %111 = arith.addf %106, %110 : vector<8x128xf32>
    %112 = arith.addf %111, %1 : vector<8x128xf32>
    %cst_36 = arith.constant dense<0.000000e+00> : vector<8xf32>
    %113 = vector.multi_reduction <add>, %112, %cst_36 [1] : vector<8x128xf32> to vector<8xf32>
    %114 = vector.shape_cast %113 : vector<8xf32> to vector<8x1xf32>
    %cst_37 = arith.constant 1.280000e+02 : f32
    %115 = vector.broadcast %cst_37 : f32 to vector<8x1xf32>
    %116 = arith.divf %114, %115 : vector<8x1xf32>
    %117 = vector.broadcast %116 : vector<8x1xf32> to vector<8x128xf32>
    %118 = arith.subf %112, %117 : vector<8x128xf32>
    %119 = arith.mulf %118, %118 : vector<8x128xf32>
    %cst_38 = arith.constant dense<0.000000e+00> : vector<8xf32>
    %120 = vector.multi_reduction <add>, %119, %cst_38 [1] : vector<8x128xf32> to vector<8xf32>
    %121 = vector.shape_cast %120 : vector<8xf32> to vector<8x1xf32>
    %cst_39 = arith.constant 1.280000e+02 : f32
    %122 = vector.broadcast %cst_39 : f32 to vector<8x1xf32>
    %123 = arith.divf %121, %122 : vector<8x1xf32>
    %cst_40 = arith.constant 9.99999974E-6 : f32
    %124 = vector.broadcast %cst_40 : f32 to vector<8x1xf32>
    %125 = arith.addf %123, %124 : vector<8x1xf32>
    %126 = math.rsqrt %125 : vector<8x1xf32>
    %127 = vector.broadcast %126 : vector<8x1xf32> to vector<8x128xf32>
    %128 = arith.mulf %118, %127 : vector<8x128xf32>
    %c0_41 = arith.constant 0 : index
    %c0_42 = arith.constant 0 : index
    %129 = vector.load %arg8[%c0_41, %c0_42] : memref<1x128xf32, #tpu.memory_space<vmem>>, vector<1x128xf32>
    %130 = vector.shape_cast %129 : vector<1x128xf32> to vector<128xf32>
    %131 = vector.shape_cast %130 : vector<128xf32> to vector<1x128xf32>
    %132 = vector.broadcast %131 : vector<1x128xf32> to vector<8x128xf32>
    %133 = arith.mulf %128, %132 : vector<8x128xf32>
    %c0_43 = arith.constant 0 : index
    %c0_44 = arith.constant 0 : index
    %134 = vector.load %arg9[%c0_43, %c0_44] : memref<1x128xf32, #tpu.memory_space<vmem>>, vector<1x128xf32>
    %135 = vector.shape_cast %134 : vector<1x128xf32> to vector<128xf32>
    %136 = vector.shape_cast %135 : vector<128xf32> to vector<1x128xf32>
    %137 = vector.broadcast %136 : vector<1x128xf32> to vector<8x128xf32>
    %138 = arith.addf %133, %137 : vector<8x128xf32>
    %139 = arith.truncf %138 : vector<8x128xf32> to vector<8x128xbf16>
    %c0_45 = arith.constant 0 : index
    %c0_46 = arith.constant 0 : index
    %140 = vector.load %arg10[%c0_45, %c0_46] : memref<128x256xbf16, #tpu.memory_space<vmem>>, vector<128x256xbf16>
    %cst_47 = arith.constant dense<0.000000e+00> : vector<8x256xf32>
    %141 = tpu.matmul %139, %140, %cst_47 {dimension_numbers = #tpu.dot_dimension_numbers<[1], [0], [0], [1], [0, 0, 1, 1], [], []>} : vector<8x128xbf16>, vector<128x256xbf16>, vector<8x256xf32> -> vector<8x256xf32>
    %c0_48 = arith.constant 0 : index
    %c0_49 = arith.constant 0 : index
    %142 = vector.load %arg11[%c0_48, %c0_49] : memref<1x256xf32, #tpu.memory_space<vmem>>, vector<1x256xf32>
    %143 = vector.shape_cast %142 : vector<1x256xf32> to vector<256xf32>
    %144 = vector.shape_cast %143 : vector<256xf32> to vector<1x256xf32>
    %145 = vector.broadcast %144 : vector<1x256xf32> to vector<8x256xf32>
    %146 = arith.addf %141, %145 : vector<8x256xf32>
    %cst_50 = arith.constant dense<0.000000e+00> : vector<8xf32>
    %147 = vector.multi_reduction <add>, %146, %cst_50 [1] : vector<8x256xf32> to vector<8xf32>
    %148 = vector.shape_cast %147 : vector<8xf32> to vector<8x1xf32>
    %cst_51 = arith.constant 2.560000e+02 : f32
    %149 = vector.broadcast %cst_51 : f32 to vector<8x1xf32>
    %150 = arith.divf %148, %149 : vector<8x1xf32>
    %151 = vector.broadcast %150 : vector<8x1xf32> to vector<8x256xf32>
    %152 = arith.subf %146, %151 : vector<8x256xf32>
    %153 = arith.mulf %152, %152 : vector<8x256xf32>
    %cst_52 = arith.constant dense<0.000000e+00> : vector<8xf32>
    %154 = vector.multi_reduction <add>, %153, %cst_52 [1] : vector<8x256xf32> to vector<8xf32>
    %155 = vector.shape_cast %154 : vector<8xf32> to vector<8x1xf32>
    %cst_53 = arith.constant 2.560000e+02 : f32
    %156 = vector.broadcast %cst_53 : f32 to vector<8x1xf32>
    %157 = arith.divf %155, %156 : vector<8x1xf32>
    %cst_54 = arith.constant 9.99999974E-6 : f32
    %158 = vector.broadcast %cst_54 : f32 to vector<8x1xf32>
    %159 = arith.addf %157, %158 : vector<8x1xf32>
    %160 = math.rsqrt %159 : vector<8x1xf32>
    %161 = vector.broadcast %160 : vector<8x1xf32> to vector<8x256xf32>
    %162 = arith.mulf %152, %161 : vector<8x256xf32>
    %c0_55 = arith.constant 0 : index
    %c0_56 = arith.constant 0 : index
    %163 = vector.load %arg12[%c0_55, %c0_56] : memref<1x256xf32, #tpu.memory_space<vmem>>, vector<1x256xf32>
    %164 = vector.shape_cast %163 : vector<1x256xf32> to vector<256xf32>
    %165 = vector.shape_cast %164 : vector<256xf32> to vector<1x256xf32>
    %166 = vector.broadcast %165 : vector<1x256xf32> to vector<8x256xf32>
    %167 = arith.mulf %162, %166 : vector<8x256xf32>
    %c0_57 = arith.constant 0 : index
    %c0_58 = arith.constant 0 : index
    %168 = vector.load %arg13[%c0_57, %c0_58] : memref<1x256xf32, #tpu.memory_space<vmem>>, vector<1x256xf32>
    %169 = vector.shape_cast %168 : vector<1x256xf32> to vector<256xf32>
    %170 = vector.shape_cast %169 : vector<256xf32> to vector<1x256xf32>
    %171 = vector.broadcast %170 : vector<1x256xf32> to vector<8x256xf32>
    %172 = arith.addf %167, %171 : vector<8x256xf32>
    %cst_59 = arith.constant 0.000000e+00 : f32
    %173 = vector.broadcast %cst_59 : f32 to vector<8x256xf32>
    %174 = arith.cmpf ogt, %172, %173 : vector<8x256xf32>
    %cst_60 = arith.constant 0.000000e+00 : f32
    %175 = vector.broadcast %cst_60 : f32 to vector<8x256xf32>
    %176 = arith.minimumf %172, %175 : vector<8x256xf32>
    %177 = math.exp %176 : vector<8x256xf32>
    %cst_61 = arith.constant 1.000000e+00 : f32
    %178 = vector.broadcast %cst_61 : f32 to vector<8x256xf32>
    %179 = arith.subf %177, %178 : vector<8x256xf32>
    %180 = arith.select %174, %172, %179 : vector<8x256xi1>, vector<8x256xf32>
    %181 = arith.truncf %180 : vector<8x256xf32> to vector<8x256xbf16>
    %c0_62 = arith.constant 0 : index
    %c0_63 = arith.constant 0 : index
    %182 = vector.load %arg14[%c0_62, %c0_63] : memref<256x128xbf16, #tpu.memory_space<vmem>>, vector<256x128xbf16>
    %cst_64 = arith.constant dense<0.000000e+00> : vector<8x128xf32>
    %183 = tpu.matmul %181, %182, %cst_64 {dimension_numbers = #tpu.dot_dimension_numbers<[1], [0], [0], [1], [0, 0, 1, 1], [], []>} : vector<8x256xbf16>, vector<256x128xbf16>, vector<8x128xf32> -> vector<8x128xf32>
    %c0_65 = arith.constant 0 : index
    %c0_66 = arith.constant 0 : index
    %184 = vector.load %arg15[%c0_65, %c0_66] : memref<1x128xf32, #tpu.memory_space<vmem>>, vector<1x128xf32>
    %185 = vector.shape_cast %184 : vector<1x128xf32> to vector<128xf32>
    %186 = vector.shape_cast %185 : vector<128xf32> to vector<1x128xf32>
    %187 = vector.broadcast %186 : vector<1x128xf32> to vector<8x128xf32>
    %188 = arith.addf %183, %187 : vector<8x128xf32>
    %189 = arith.addf %112, %188 : vector<8x128xf32>
    %190 = vector.shape_cast %189 : vector<8x128xf32> to vector<1x8x128xf32>
    %c0_67 = arith.constant 0 : index
    %c0_68 = arith.constant 0 : index
    %c0_69 = arith.constant 0 : index
    %191 = vector.load %arg16[%c0_67, %c0_68, %c0_69] : memref<1x8x128xf32, #tpu.memory_space<vmem>>, vector<1x8x128xf32>
    tpu.vector_store %arg16[%c0_67, %c0_68, %c0_69], %190 {strides = array<i32>} : memref<1x8x128xf32, #tpu.memory_space<vmem>>, vector<1x8x128xf32>,
    return
  }
  func.func @transform_0(%arg0: i32) -> (i32, i32, i32) {
    %c0_i32 = arith.constant 0 : i32
    %c0_i32_0 = arith.constant 0 : i32
    %c0_i32_1 = arith.constant 0 : i32
    return %arg0, %c0_i32, %c0_i32_0 : i32, i32, i32
  }
  func.func @transform_1(%arg0: i32) -> (i32, i32) {
    %c0_i32 = arith.constant 0 : i32
    %c0_i32_0 = arith.constant 0 : i32
    %c0_i32_1 = arith.constant 0 : i32
    return %c0_i32, %c0_i32_0 : i32, i32
  }
  func.func @transform_2(%arg0: i32) -> (i32, i32) {
    %c0_i32 = arith.constant 0 : i32
    %c0_i32_0 = arith.constant 0 : i32
    %c0_i32_1 = arith.constant 0 : i32
    return %c0_i32, %c0_i32_0 : i32, i32
  }
  func.func @transform_3(%arg0: i32) -> (i32, i32) {
    %c0_i32 = arith.constant 0 : i32
    %c0_i32_0 = arith.constant 0 : i32
    %c0_i32_1 = arith.constant 0 : i32
    return %c0_i32, %c0_i32_0 : i32, i32
  }
  func.func @transform_4(%arg0: i32) -> (i32, i32) {
    %c0_i32 = arith.constant 0 : i32
    %c0_i32_0 = arith.constant 0 : i32
    %c0_i32_1 = arith.constant 0 : i32
    return %c0_i32, %c0_i32_0 : i32, i32
  }
  func.func @transform_5(%arg0: i32) -> (i32, i32) {
    %c0_i32 = arith.constant 0 : i32
    %c0_i32_0 = arith.constant 0 : i32
    %c0_i32_1 = arith.constant 0 : i32
    return %c0_i32, %c0_i32_0 : i32, i32
  }
  func.func @transform_6(%arg0: i32) -> (i32, i32) {
    %c0_i32 = arith.constant 0 : i32
    %c0_i32_0 = arith.constant 0 : i32
    %c0_i32_1 = arith.constant 0 : i32
    return %c0_i32, %c0_i32_0 : i32, i32
  }
  func.func @transform_7(%arg0: i32) -> (i32, i32) {
    %c0_i32 = arith.constant 0 : i32
    %c0_i32_0 = arith.constant 0 : i32
    %c0_i32_1 = arith.constant 0 : i32
    return %c0_i32, %c0_i32_0 : i32, i32
  }
  func.func @transform_8(%arg0: i32) -> (i32, i32) {
    %c0_i32 = arith.constant 0 : i32
    %c0_i32_0 = arith.constant 0 : i32
    %c0_i32_1 = arith.constant 0 : i32
    return %c0_i32, %c0_i32_0 : i32, i32
  }
  func.func @transform_9(%arg0: i32) -> (i32, i32) {
    %c0_i32 = arith.constant 0 : i32
    %c0_i32_0 = arith.constant 0 : i32
    %c0_i32_1 = arith.constant 0 : i32
    return %c0_i32, %c0_i32_0 : i32, i32
  }
  func.func @transform_10(%arg0: i32) -> (i32, i32) {
    %c0_i32 = arith.constant 0 : i32
    %c0_i32_0 = arith.constant 0 : i32
    %c0_i32_1 = arith.constant 0 : i32
    return %c0_i32, %c0_i32_0 : i32, i32
  }
  func.func @transform_11(%arg0: i32) -> (i32, i32) {
    %c0_i32 = arith.constant 0 : i32
    %c0_i32_0 = arith.constant 0 : i32
    %c0_i32_1 = arith.constant 0 : i32
    return %c0_i32, %c0_i32_0 : i32, i32
  }
  func.func @transform_12(%arg0: i32) -> (i32, i32) {
    %c0_i32 = arith.constant 0 : i32
    %c0_i32_0 = arith.constant 0 : i32
    %c0_i32_1 = arith.constant 0 : i32
    return %c0_i32, %c0_i32_0 : i32, i32
  }
  func.func @transform_13(%arg0: i32) -> (i32, i32) {
    %c0_i32 = arith.constant 0 : i32
    %c0_i32_0 = arith.constant 0 : i32
    %c0_i32_1 = arith.constant 0 : i32
    return %c0_i32, %c0_i32_0 : i32, i32
  }
  func.func @transform_14(%arg0: i32) -> (i32, i32) {
    %c0_i32 = arith.constant 0 : i32
    %c0_i32_0 = arith.constant 0 : i32
    %c0_i32_1 = arith.constant 0 : i32
    return %c0_i32, %c0_i32_0 : i32, i32
  }
  func.func @transform_15(%arg0: i32) -> (i32, i32, i32) {
    %c0_i32 = arith.constant 0 : i32
    %c0_i32_0 = arith.constant 0 : i32
    %c0_i32_1 = arith.constant 0 : i32
    return %arg0, %c0_i32, %c0_i32_0 : i32, i32, i32
  }
}

</mosaic_0001>

<bundles_post_ra>
// kernel: tpu_custom_call.1
= control target key start
LH: loop header
LB: loop body
LE: loop exit
PB: predicated region body
PF: predicated region fallthrough
CT: control target
= control target key end

     0   :  { %s3323_s0 = inlined_call_operand.hbm [shape: f32[2,8,128], index: 0, kind: input, shape index: {}]   ;;  %s3324_s1 = inlined_call_operand.hbm [shape: f32[1,128], index: 1, kind: input, shape index: {}]   ;;  %s3325_s2 = inlined_call_operand.hbm [shape: f32[1,128], index: 2, kind: input, shape index: {}]   ;;  %s3326_s3 = inlined_call_operand.hbm [shape: bf16[128,384], index: 3, kind: input, shape index: {}]   ;;  %s3327_s4 = inlined_call_operand.vmem [shape: f32[1,384], index: 4, kind: input, shape index: {}]   ;;  %s3328_s5 = inlined_call_operand.hbm [shape: bf16[128,128], index: 5, kind: input, shape index: {}]   ;;  %s3329_s6 = inlined_call_operand.vmem [shape: f32[1,128], index: 6, kind: input, shape index: {}]   ;;  %s3330_s7 = inlined_call_operand.vmem [shape: f32[1,128], index: 7, kind: input, shape index: {}]   ;;  %s3331_s8 = inlined_call_operand.vmem [shape: f32[1,128], index: 8, kind: input, shape index: {}]   ;;  %s3332_s9 = inlined_call_operand.hbm [shape: bf16[128,256], index: 9, kind: input, shape index: {}]   ;;  %s3333_s10 = inlined_call_operand.vmem [shape: f32[1,256], index: 10, kind: input, shape index: {}]   ;;  %s3334_s11 = inlined_call_operand.vmem [shape: f32[1,256], index: 11, kind: input, shape index: {}]   ;;  %s3335_s12 = inlined_call_operand.vmem [shape: f32[1,256], index: 12, kind: input, shape index: {}]   ;;  %s3336_s13 = inlined_call_operand.hbm [shape: bf16[256,128], index: 13, kind: input, shape index: {}]   ;;  %s3337_s14 = inlined_call_operand.vmem [shape: f32[1,128], index: 14, kind: input, shape index: {}]   ;;  %s3338_s15 = inlined_call_operand.hbm [shape: f32[2,8,128], index: 15, kind: output, shape index: {}]  }
   0x1   :  { %3343 = sst [smem:[#allocation20_spill]] %s3324_s1 }
   0x2   :  { %3344 = sst [smem:[#allocation21_spill]] %s3326_s3 }
   0x3   :  { %3345 = sst [smem:[#allocation22_spill]] %s3330_s7 }
   0x4   :  { %3346 = sst [smem:[#allocation23_spill]] %s3331_s8 }
   0x5   :  { %3347 = sst [smem:[#allocation24_spill]] %s3333_s10 }
   0x6   :  { %3348 = sst [smem:[#allocation25_spill]] %s3334_s11 }
   0x7   :  { %3349 = sst [smem:[#allocation26_spill]] %s3335_s12 }
   0x8   :  { %3350 = sst [smem:[#allocation27_spill]] %s3337_s14 }
   0x9   :  { %3351 = sst [smem:[#allocation28_spill]] %s3338_s15 }
   0xa   :  { %20 = vsyncpa [#allocation3], 0 }
   0xb   :  { %22 = vsyncpa [#allocation3 + $0x1], 0 }
   0xc   :  { %23 = vsyncpa [#allocation6], 0 }
   0xd   :  { %24 = vsyncpa [#allocation9], 0 }
   0xe   :  { %25 = vsyncpa [#allocation12], 0 }
   0xf   :  { %26 = vsyncpa [#allocation4], 0 }
  0x10   :  { %28 = vsyncpa [#allocation4 + $0x1], 0  ;;  %s2860_s18 = smov 0   ;;  %s2862_s19 = smov 0  }
  0x11   :  { %s2864_s20 = smov 0   ;;  %s2866_s21 = smov 0  }
  0x12 LB: > { %s2760_s22 = smov [#allocation5]   ;;  %s2881_s24 = sadd.s32 4294967295, %s2758_s21   ;;  %s2758_s21 = sphi %s2866_s21, %s3383_s21   ;;  %s2754_s20 = sphi %s2864_s20, %s3382_s20   ;;  %s2750_s19 = sphi %s2862_s19, %s3381_s19   ;;  %s2746_s18 = sphi %s2860_s18, %s3380_s18  }
  0x13   : > { %s398_s23 = sshll.u32 %s2760_s22, 4  ;;  %p2010_p0 = scmp.ge.s32.totalorder %s2758_s21, 1  ;;  %s2886_s23 = int_to_ptr.vmem [resolvable:$true] %s398_s23 }
  0x14   : > { %p3340_p1 = scmp.eq.s32.totalorder %s2881_s24, 0  ;;  %p385_p2 = scmp.lt.s32.totalorder %s2758_s21, 3 }
  0x15   : > { %s2761_s26 = smov [#allocation8]   ;;  %s2762_s29 = smov [#allocation11]  }
  0x16   : > { %p2888_p3 = pnand %p2010_p0, %p385_p2  ;;  %s419_s27 = sshll.u32 %s2761_s26, 4  ;;  %s2895_s27 = int_to_ptr.vmem [resolvable:$true] %s419_s27 }
  0x17   : > { %s457_s30 = sshll.u32 %s2762_s29, 4  ;;  %s3354_s1 = sld [smem:[#allocation20_spill]]  ;;  %s2903_s30 = int_to_ptr.vmem [resolvable:$true] %s457_s30 }
  0x18   : > { %s3352_s25 = scalar_select %p2888_p3, 1, 0 }
  0x19   : > { %p2285_p5 = pneg %p2888_p3 }
  0x1b   : > { %p2899_p6 = pnand %p2285_p5, %p3340_p1 }
  0x1d   : > { %s2482_s22 = scalar_lea.hbm %s3354_s1, 16  ;;  %p2913_p8 = pneg %p2899_p6 }
  0x1e   : > { %p2483_p7 = scmp.ne.s32.totalorder %s3354_s1, %s2482_s22  ;;  %p2489_p11 = scmp.lt.u32.totalorder %s2482_s22, %s3354_s1 }
  0x20   : > { %p2485_p9 = pnand %p2913_p8, %p2483_p7 }
  0x22   : > { %p2486_p10 = pneg %p2485_p9 }
  0x24   : > { %p2491_p12 = pnand %p2489_p11, %p2486_p10 }
  0x26   : > { %2494 = shalt.err (!%p2491_p12)
}
  0x27   : > { %s2495_s14 = scalar_lea.vmem %s2886_s23, 16  ;;  %s2502_s15 = scalar_lea.vmem %s2886_s23, 32 }
  0x28   : > { %p2496_p13 = scmp.ne.s32.totalorder %s2886_s23, %s2495_s14  ;;  %p2503_p5 = scmp.lt.s32.totalorder %s2886_s23, %s2886_s23 }
  0x29   : > { %p2504_p7 = scmp.lt.s32.totalorder %s2502_s15, %s2495_s14 }
  0x2a   : > { %p2498_p0 = pnand %p2496_p13, %p2913_p8 }
  0x2b   : > { %p2505_p9 = por %p2504_p7, %p2503_p5 }
  0x2c   : > { %p2499_p2 = pneg %p2498_p0 }
  0x2e   : > { %p2506_p4 = pnand %p2505_p9, %p2499_p2 }
  0x30   : > { %2509 = shalt.err (!%p2506_p4)
}
  0x31   : > { %2288 = dma.hbm_to_vmem [thread:$0]  (!%p2899_p6), %s3354_s1, 16, %s2886_s23, [#allocation6]  }
  0x32   : > { %s3356_s3 = sld [smem:[#allocation21_spill]] }
  0x38   : > { %s2510_s29 = scalar_lea.hbm %s3356_s3, 3072 }
  0x39   : > { %p2511_p10 = scmp.ne.s32.totalorder %s3356_s3, %s2510_s29  ;;  %p2517_p4 = scmp.lt.u32.totalorder %s2510_s29, %s3356_s3 }
  0x3b   : > { %p2513_p11 = pnand %p2511_p10, %p2913_p8 }
  0x3d   : > { %p2514_p12 = pneg %p2513_p11 }
  0x3f   : > { %p2519_p13 = pnand %p2517_p4, %p2514_p12 }
  0x41   : > { %2522 = shalt.err (!%p2519_p13)
}
  0x42   : > { %s2523_s23 = scalar_lea.vmem %s2895_s27, 3072  ;;  %p2531_p7 = scmp.lt.s32.totalorder %s2895_s27, %s2895_s27 }
  0x43   : > { %p2524_p0 = scmp.ne.s32.totalorder %s2895_s27, %s2523_s23  ;;  %p2532_p9 = scmp.lt.s32.totalorder %s2523_s23, %s2523_s23 }
  0x45   : > { %p2526_p2 = pnand %p2524_p0, %p2913_p8  ;;  %p2533_p10 = por %p2532_p9, %p2531_p7 }
  0x47   : > { %p2527_p5 = pneg %p2526_p2 }
  0x49   : > { %p2534_p11 = pnand %p2533_p10, %p2527_p5 }
  0x4b   : > { %2537 = shalt.err (!%p2534_p11)
}
  0x4c   : > { %s2763_s10 = smov 192   ;;  %s2764_s11 = smov 12  }
  0x4d   : > { %2294 = dma.hbm_to_vmem [thread:$0]  (!%p2899_p6), %s3356_s3, 3072, %s2895_s27, [#allocation9], %s2763_s10, %s2763_s10, %s2764_s11  }
  0x4e   : > { %s2538_s29 = scalar_lea.hbm %s3332_s9, 2048 }
  0x4f   : > { %p2539_p12 = scmp.ne.s32.totalorder %s3332_s9, %s2538_s29  ;;  %p2545_p0 = scmp.lt.u32.totalorder %s2538_s29, %s3332_s9 }
  0x51   : > { %p2541_p4 = pnand %p2539_p12, %p2913_p8 }
  0x53   : > { %p2542_p13 = pneg %p2541_p4 }
  0x55   : > { %p2547_p2 = pnand %p2545_p0, %p2542_p13 }
  0x57   : > { %2550 = shalt.err (!%p2547_p2)
}
  0x58   : > { %s2551_s27 = scalar_lea.vmem %s2903_s30, 2048  ;;  %p2559_p10 = scmp.lt.s32.totalorder %s2903_s30, %s2903_s30 }
  0x59   : > { %p2552_p5 = scmp.ne.s32.totalorder %s2903_s30, %s2551_s27  ;;  %p2560_p11 = scmp.lt.s32.totalorder %s2551_s27, %s2551_s27 }
  0x5b   : > { %p2554_p7 = pnand %p2552_p5, %p2913_p8  ;;  %p2561_p12 = por %p2560_p11, %p2559_p10 }
  0x5d   : > { %p2555_p9 = pneg %p2554_p7 }
  0x5f   : > { %p2562_p4 = pnand %p2561_p12, %p2555_p9 }
  0x61   : > { %2565 = shalt.err (!%p2562_p4)
}
  0x62   : > { %s2765_s10 = smov 128   ;;  %s2766_s1 = smov 8  }
  0x63   : > { %2300 = dma.hbm_to_vmem [thread:$0]  (!%p2899_p6), %s3332_s9, 2048, %s2903_s30, [#allocation12], %s2765_s10, %s2765_s10, %s2766_s1  }
  0x64   : > { %s2767_s16 = smov [#allocation7]   ;;  %s2768_s22 = smov [#allocation10]  }
  0x65   : > { %s409_s17 = sshll.u32 %s2767_s16, 4  ;;  %s435_s29 = sshll.u32 %s2768_s22, 4  ;;  %s410_s17 = int_to_ptr.vmem [resolvable:$true] %s409_s17  ;;  %s436_s29 = int_to_ptr.vmem [resolvable:$true] %s435_s29 }
  0x66   : > { %s2566_s23 = scalar_lea.hbm %s3325_s2, 16 }
  0x67   : > { %p2567_p13 = scmp.ne.s32.totalorder %s3325_s2, %s2566_s23  ;;  %p2573_p5 = scmp.lt.u32.totalorder %s2566_s23, %s3325_s2 }
  0x69   : > { %p2569_p0 = pnand %p2567_p13, %p2913_p8 }
  0x6b   : > { %p2570_p2 = pneg %p2569_p0 }
  0x6d   : > { %p2575_p7 = pnand %p2573_p5, %p2570_p2 }
  0x6f   : > { %2578 = shalt.err (!%p2575_p7)
}
  0x70   : > { %s2579_s30 = scalar_lea.vmem %s410_s17, 16  ;;  %s2586_s10 = scalar_lea.vmem %s410_s17, 32 }
  0x71   : > { %p2580_p9 = scmp.ne.s32.totalorder %s410_s17, %s2579_s30  ;;  %p2587_p12 = scmp.lt.s32.totalorder %s410_s17, %s410_s17 }
  0x72   : > { %p2588_p4 = scmp.lt.s32.totalorder %s2586_s10, %s2579_s30 }
  0x73   : > { %p2582_p10 = pnand %p2580_p9, %p2913_p8 }
  0x74   : > { %p2589_p1 = por %p2588_p4, %p2587_p12 }
  0x75   : > { %p2583_p11 = pneg %p2582_p10 }
  0x77   : > { %p2590_p3 = pnand %p2589_p1, %p2583_p11 }
  0x79   : > { %2593 = shalt.err (!%p2590_p3)
}
  0x7a   : > { %2291 = dma.hbm_to_vmem [thread:$0]  (!%p2899_p6), %s3325_s2, 16, %s410_s17, [#allocation6]  }
  0x7b   : > { %s2594_s11 = scalar_lea.hbm %s3328_s5, 1024 }
  0x7c   : > { %p2595_p13 = scmp.ne.s32.totalorder %s3328_s5, %s2594_s11  ;;  %p2601_p3 = scmp.lt.u32.totalorder %s2594_s11, %s3328_s5 }
  0x7e   : > { %p2597_p0 = pnand %p2595_p13, %p2913_p8 }
  0x80   : > { %p2598_p1 = pneg %p2597_p0 }
  0x82   : > { %p2603_p2 = pnand %p2601_p3, %p2598_p1 }
  0x84   : > { %2606 = shalt.err (!%p2603_p2)
}
  0x85   : > { %s2607_s15 = scalar_lea.vmem %s436_s29, 1024  ;;  %p2615_p10 = scmp.lt.s32.totalorder %s436_s29, %s436_s29 }
  0x86   : > { %p2608_p5 = scmp.ne.s32.totalorder %s436_s29, %s2607_s15  ;;  %p2616_p11 = scmp.lt.s32.totalorder %s2607_s15, %s2607_s15 }
  0x88   : > { %p2610_p7 = pnand %p2608_p5, %p2913_p8  ;;  %p2617_p12 = por %p2616_p11, %p2615_p10 }
  0x8a   : > { %p2611_p9 = pneg %p2610_p7 }
  0x8c   : > { %p2618_p4 = pnand %p2617_p12, %p2611_p9 }
  0x8e   : > { %2621 = shalt.err (!%p2618_p4)
}
  0x8f   : > { %s2769_s17 = smov 64   ;;  %s2770_s23 = smov 4  }
  0x90   : > { %2297 = dma.hbm_to_vmem [thread:$0]  (!%p2899_p6), %s3328_s5, 1024, %s436_s29, [#allocation9], %s2769_s17, %s2769_s17, %s2770_s23  }
  0x91   : > { %s2771_s10 = smov [#allocation13]   ;;  %s2622_s8 = scalar_lea.hbm %s3336_s13, 2048 }
  0x92   : > { %s479_s3 = sshll.u32 %s2771_s10, 4  ;;  %p2623_p13 = scmp.ne.s32.totalorder %s3336_s13, %s2622_s8  ;;  %s480_s3 = int_to_ptr.vmem [resolvable:$true] %s479_s3 }
  0x93   : > { %p2629_p3 = scmp.lt.u32.totalorder %s2622_s8, %s3336_s13 }
  0x94   : > { %p2625_p0 = pnand %p2623_p13, %p2913_p8 }
  0x96   : > { %p2626_p1 = pneg %p2625_p0 }
  0x98   : > { %p2631_p2 = pnand %p2629_p3, %p2626_p1 }
  0x9a   : > { %2634 = shalt.err (!%p2631_p2)
}
  0x9b   : > { %s2635_s29 = scalar_lea.vmem %s480_s3, 2048  ;;  %p2643_p10 = scmp.lt.s32.totalorder %s480_s3, %s480_s3 }
  0x9c   : > { %p2636_p5 = scmp.ne.s32.totalorder %s480_s3, %s2635_s29  ;;  %p2644_p11 = scmp.lt.s32.totalorder %s2635_s29, %s2635_s29 }
  0x9e   : > { %p2638_p7 = pnand %p2636_p5, %p2913_p8  ;;  %p2645_p12 = por %p2644_p11, %p2643_p10 }
  0xa0   : > { %p2639_p9 = pneg %p2638_p7 }
  0xa2   : > { %p2646_p4 = pnand %p2645_p12, %p2639_p9 }
  0xa4   : > { %2649 = shalt.err (!%p2646_p4)
}
  0xa5   : > { %2303 = dma.hbm_to_vmem [thread:$0]  (!%p2899_p6), %s3336_s13, 2048, %s480_s3, [#allocation12], %s2769_s17, %s2769_s17, %s2770_s23  }
  0xa6   : > { %s2009_s26 = sadd.s32 4294967294, %s2758_s21   ;;  %s3037_s28 = sadd.s32 1, %s2758_s21  }
  0xa7   : > { %s38_s27 = ssub.s32 %s2758_s21, %s3037_s28  ;;  %s41_s30 = sadd.s32 1, %s2754_s20 }
  0xa8   : > { %p39_p8 = scmp.eq.s32.totalorder %s38_s27, 0  ;;  %p48_p13 = scmp.ne.s32.totalorder %s2754_s20, %s2750_s19 }
  0xa9   : > { %p49_p0 = scmp.eq.s32.totalorder %s2758_s21, 0  ;;  %p54_p1 = scmp.ne.s32.totalorder %s2750_s19, %s2746_s18 }
  0xaa   : > { %s3048_s10 = scalar_select %p39_p8, %s2754_s20, %s41_s30  }
  0xab   : > { %p3050_p3 = por %p49_p0, %p48_p13  ;;  %p3358_p2 = scmp.eq.s32.totalorder %s2881_s24, 0 }
  0xac   : > { %p372_p5 = scmp.eq.s32.totalorder %s2881_s24, 1  ;;  %p378_p7 = scmp.eq.s32.totalorder %s2009_s26, 1 }
  0xad   : > { %p3056_p6 = por %p3358_p2, %p54_p1  ;;  %p2318_p9 = scmp.lt.s32.totalorder %s2758_s21, 2 }
  0xae   : > { %s496_s23 = sand.u32 1, %s2754_s20   ;;  %p3063_p10 = por %p372_p5, %p48_p13 }
  0xaf   : > { %p3067_p11 = por %p378_p7, %p54_p1  ;;  %s2018_s8 = sshll.u32 %s496_s23, 3 }
  0xb0   : > { %s3360_s3 = scalar_select %p3063_p10, 1, 0 }
  0xb1   : > { %s3361_s7 = scalar_select %p3067_p11, 1, 0 }
  0xb2   : > { %s2019_s11 = sshll.u32 %s2758_s21, 7  ;;  %s500_s29 = scalar_lea.vmem [#allocation2], %s2018_s8 }
  0xb3   : > { %s3075_s22 = scalar_lea.hbm %s3323_s0, %s2019_s11  ;;  %s507_s14 = sshll.u32 %s500_s29, 4  ;;  %s3077_s14 = int_to_ptr.vmem [resolvable:$true] %s507_s14 }
  0xb4   : > { %p3081_p12 = pnand %p2318_p9, %p3050_p3  ;;  %s497_s26 = scalar_lea.sflag [#allocation3], %s496_s23 }
  0xb5   : > { %s2650_s27 = scalar_lea.hbm %s3075_s22, 128  ;;  %s2655_s11 = scalar_lea.hbm %s3323_s0, 256 }
  0xb6   : > { %p2651_p4 = scmp.ne.s32.totalorder %s3075_s22, %s2650_s27  ;;  %p2652_p8 = pneg %p3081_p12 }
  0xb7   : > { %p2656_p1 = scmp.lt.u32.totalorder %s3075_s22, %s3323_s0  ;;  %p2657_p3 = scmp.lt.u32.totalorder %s2655_s11, %s2650_s27 }
  0xb8   : > { %p2653_p13 = pnand %p2652_p8, %p2651_p4  ;;  %p2659_p5 = scmp.lt.u32.totalorder %s2650_s27, %s3075_s22 }
  0xb9   : > { %p2658_p2 = por %p2657_p3, %p2656_p1 }
  0xba   : > { %p2654_p0 = pneg %p2653_p13 }
  0xbb   : > { %p2660_p7 = por %p2659_p5, %p2658_p2 }
  0xbd   : > { %p2661_p9 = pnand %p2660_p7, %p2654_p0 }
  0xbf   : > { %2664 = shalt.err (!%p2661_p9)
}
  0xc0   : > { %s2665_s23 = scalar_lea.vmem %s3077_s14, 128  ;;  %s2772_s16 = smov [#allocation2]  }
  0xc1   : > { %p2666_p4 = scmp.ne.s32.totalorder %s3077_s14, %s2665_s23  ;;  %s2670_s29 = sshll.u32 %s2772_s16, 4  ;;  %s2671_s29 = int_to_ptr.vmem [resolvable:$false] %s2670_s29 }
  0xc2   : > { %s2672_s30 = scalar_lea.vmem %s2671_s29, 256  ;;  %p2673_p10 = scmp.lt.s32.totalorder %s3077_s14, %s2671_s29 }
  0xc3   : > { %p2668_p13 = pnand %p2666_p4, %p2652_p8  ;;  %p2674_p1 = scmp.lt.s32.totalorder %s2672_s30, %s2665_s23 }
  0xc5   : > { %p2669_p11 = pneg %p2668_p13  ;;  %p2675_p3 = por %p2674_p1, %p2673_p10 }
  0xc7   : > { %p2676_p2 = pnand %p2675_p3, %p2669_p11 }
  0xc9   : > { %2679 = shalt.err (!%p2676_p2)
}
  0xca   : > { %2307 = dma.hbm_to_vmem [thread:$0]  (!%p3081_p12), %s3075_s22, 128, %s3077_s14, %s497_s26  }
  0xcb   : > { %p3363_p0 = scmp.ne.s32.totalorder %s3352_s25, 0 }
  0xcc   : > { %s3113_s27 = sand.u32 (!%p3363_p0), 1, %s2750_s19  }
  0xcd   : > { %516 = sbr.rel (%p3363_p0) target bundleno = 3485 (0xd9d), region = 80  ;;  %s2021_s8 = sshll.u32 (!%p3363_p0), %s3113_s27, 3 }
  0xce   : > { %s519_s11 = scalar_lea.sflag (!%p3363_p0), [#allocation3], %s3113_s27  ;;  %s522_s1 = scalar_lea.vmem (!%p3363_p0), [#allocation2], %s2021_s8 }
  0xd4   : > { %2725 = dma.done.wait (%p3056_p6), %s519_s11, 128  }
  0xd5   : > { %2727 = vsyncadd (%p3056_p6), %s519_s11, 4294967168  ;;  %p3364_p10 = scmp.eq.s32.totalorder %s2881_s24, 0 }
  0xd7   : > { %2729 = dma.done.wait (%p3364_p10), [#allocation6], 32   ;;  %p3365_p11 = pmov %p3364_p10 }
  0xd8   : > { %p3366_p12 = pmov %p3364_p10 }
  0xd9   : > { %2731 = vsyncadd (%p3365_p11), [#allocation6], 4294967264 }
  0xda   : > { %2733 = dma.done.wait (%p3366_p12), [#allocation9], 4096   ;;  %p3367_p8 = pmov %p3364_p10 }
  0xdc   : > { %2735 = vsyncadd (%p3367_p8), [#allocation9], 4294963200  ;;  %p3368_p5 = pmov %p3367_p8 }
  0xde   : > { %2737 = dma.done.wait (%p3368_p5), [#allocation12], 4096   ;;  %p3369_p7 = pmov %p3368_p5 }
  0xdf   : > { %v3135_v0 = vld [vmem:[%s522_s1] sm:$0xff]  ;;  %v2773_v3 = vmov 0.0   ;;  %v2380_v5 = vld [vmem:[#allocation8 + $0x1c] ss:$12 sps:$4 sm:$0xff]   ;;  %v2774_v25 = vmov 0   ;;  %vm2775_vm0 = vmmov 0   ;;  %v658_v41 = vlaneseq }
  0xe0   : > { %2739 = vsyncadd (%p3369_p7), [#allocation12], 4294963200  ;;  %595 = vadd.xlane.f32.xlu0 %v3135_v0  ;;  %v2376_v1 = vld [vmem:[#allocation8 + $0x4] ss:$12 sps:$4 sm:$0xff]   ;;  %v2378_v2 = vld [vmem:[#allocation8] ss:$12 sps:$4 sm:$0xff]   ;;  %2169 = vmatprep.subr.bf16.mxu1 %v2773_v3 }
  0xe1   : > { %v2379_v4 = vld [vmem:[#allocation8 + $0x8] ss:$12 sps:$4 sm:$0xff]   ;;  %v2382_v6 = vld [vmem:[#allocation8 + $0x18] ss:$12 sps:$4 sm:$0xff]   ;;  %801 = vmatprep.subr.bf16.mxu0 %v2376_v1  ;;  %v2383_v7 = vld [vmem:[#allocation8 + $0x20] ss:$12 sps:$4 sm:$0xff]   ;;  %833 = vmatprep.mubr.bf16.mxu0 %v2774_v25 }
  0xe2   : > { %v2384_v8 = vld [vmem:[#allocation8 + $0x34] ss:$12 sps:$4 sm:$0xff]   ;;  %802 = vmatpush1.bf16.msra.mxu0 %v2378_v2  ;;  %2170 = vmatpush3.bf16.msra.mxu1 %v2379_v4  ;;  %v2386_v13 = vld [vmem:[#allocation8 + $0x30] ss:$12 sps:$4 sm:$0xff]   ;;  %v2387_v14 = vld [vmem:[#allocation8 + $0x38] ss:$12 sps:$4 sm:$0xff]  }
  0xe3   : > { %803 = vmatprep.subr.bf16.mxu0 %v2380_v5  ;;  %2171 = vmatprep.subr.bf16.mxu1 %v2773_v3  ;;  %v2388_v15 = vld [vmem:[#allocation8 + $0x4c] ss:$12 sps:$4 sm:$0xff]   ;;  %v2390_v16 = vld [vmem:[#allocation8 + $0x48] ss:$12 sps:$4 sm:$0xff]   ;;  %v2391_v17 = vld [vmem:[#allocation8 + $0x50] ss:$12 sps:$4 sm:$0xff]  }
  0xe4   : > { %v2392_v18 = vld [vmem:[#allocation8 + $0x64] ss:$12 sps:$4 sm:$0xff]   ;;  %v2394_v19 = vld [vmem:[#allocation8 + $0x60] ss:$12 sps:$4 sm:$0xff]   ;;  %v2395_v20 = vld [vmem:[#allocation8 + $0x68] ss:$12 sps:$4 sm:$0xff]   ;;  %2185 = vmatprep.mubr.msk.bf16.mxu1 %vm2775_vm0, %v2773_v3 }
  0xe5   : > { %v2396_v21 = vld [vmem:[#allocation8 + $0x7c] ss:$12 sps:$4 sm:$0xff]   ;;  %v2398_v22 = vld [vmem:[#allocation8 + $0x78] ss:$12 sps:$4 sm:$0xff]   ;;  %v2399_v23 = vld [vmem:[#allocation8 + $0x80] ss:$12 sps:$4 sm:$0xff]  }
  0xe6   : > { %804 = vmatpush1.bf16.msra.mxu0 %v2382_v6  ;;  %2172 = vmatpush3.bf16.msra.mxu1 %v2383_v7  ;;  %v2400_v24 = vld [vmem:[#allocation8 + $0x94] ss:$12 sps:$4 sm:$0xff]   ;;  %v2402_v26 = vld [vmem:[#allocation8 + $0x90] ss:$12 sps:$4 sm:$0xff]   ;;  %v2403_v27 = vld [vmem:[#allocation8 + $0x98] ss:$12 sps:$4 sm:$0xff]  }
  0xe7   : > { %805 = vmatprep.subr.bf16.mxu0 %v2384_v8  ;;  %2173 = vmatprep.subr.bf16.mxu1 %v2773_v3  ;;  %v2404_v28 = vld [vmem:[#allocation8 + $0xac] ss:$12 sps:$4 sm:$0xff]   ;;  %v2406_v29 = vld [vmem:[#allocation8 + $0xa8] ss:$12 sps:$4 sm:$0xff]   ;;  %v2407_v30 = vld [vmem:[#allocation8 + $0xb0] ss:$12 sps:$4 sm:$0xff]  }
  0xe8   : > { %v2029_v35 = vld [vmem:[#allocation5] ss:$0 sm:$0xff]  ;;  %v2030_v37 = vld [vmem:[#allocation7] ss:$0 sm:$0xff]  ;;  %v659_v42 = vshrl.u32 %v658_v41, 7  ;;  %vm885_vm1 = vcmask 261120  }
  0xe9   : > { %v656_v44 = vld [vmem:[%s3327_s4] sm:$0x7]  ;;  %s2776_s22 = smov 96   ;;  %s2777_s14 = smov 32   ;;  %vm948_vm2 = vcmask 1043456   ;;  %vm932_vm3 = vcmask 64512  }
  0xea   : > { %806 = vmatpush1.bf16.msra.mxu0 %v2386_v13  ;;  %2174 = vmatpush3.bf16.msra.mxu1 %v2387_v14  ;;  %v3156_v43 = vsub.s32 1, %v659_v42  ;;  %v668_v45 = vsub.s32 2, %v659_v42  ;;  %v3162_v47 = vsub.s32 0, %v659_v42  ;;  %s2778_s15 = smov 64   ;;  %vm1338_vm4 = vcmask 523264   ;;  %s3370_s29 = sld [smem:[#allocation22_spill]] }
  0xeb   : > { %2175 = vmatprep.subr.bf16.mxu1 %v2773_v3  ;;  %807 = vmatprep.subr.bf16.mxu0 %v2388_v15  ;;  %vm1340_vm5 = vcmask 785408   ;;  %s3371_s1 = sld [smem:[#allocation23_spill]]  ;;  %s3373_s26 = sld [smem:[#allocation25_spill]] }
  0xec   : > { %v665_v46 = vrot.slane %v656_v44, %v3156_v43  ;;  %v669_v52 = vrot.slane %v656_v44, %v668_v45  ;;  %v661_v58 = vrot.slane %v656_v44, %v3162_v47  ;;  %s3374_s16 = sld [smem:[#allocation26_spill]]  ;;  %s3375_s11 = sld [smem:[#allocation27_spill]] }
  0xed   : > { %s592_s25 = scalar_lea.vmem [#allocation14], %s2021_s8  ;;  %s1869_s12 = scalar_lea.sflag [#allocation4], %s3113_s27 }
  0xee   : > { %808 = vmatpush1.bf16.msra.mxu0 %v2390_v16  ;;  %2176 = vmatpush3.bf16.msra.mxu1 %v2391_v17  ;;  %s1882_s17 = sshll.u32 %s592_s25, 4  ;;  %p3377_p9 = scmp.ne.s32.totalorder %s3360_s3, 0  ;;  %s3281_s17 = int_to_ptr.vmem [resolvable:$true] %s1882_s17 }
  0xef   : > { %2177 = vmatprep.subr.bf16.mxu1 %v2773_v3  ;;  %809 = vmatprep.subr.bf16.mxu0 %v2392_v18  ;;  %s2680_s23 = scalar_lea.vmem %s3281_s17, 128 }
  0xf0   : > { %p2681_p6 = scmp.ne.s32.totalorder %s3281_s17, %s2680_s23 }
  0xf2   : > { %810 = vmatpush1.bf16.msra.mxu0 %v2394_v19  ;;  %2178 = vmatpush3.bf16.msra.mxu1 %v2395_v20  ;;  %p2682_p4 = pnand %p2681_p6, %p3377_p9 }
  0xf3   : > { %811 = vmatprep.subr.bf16.mxu0 %v2396_v21  ;;  %2179 = vmatprep.subr.bf16.mxu1 %v2773_v3 }
  0xf4   : > { %p2683_p13 = pneg %p2682_p4 }
  0xf6   : > { %812 = vmatpush1.bf16.msra.mxu0 %v2398_v22  ;;  %2180 = vmatpush3.bf16.msra.mxu1 %v2399_v23 }
  0xf7   : > { %813 = vmatprep.subr.bf16.mxu0 %v2400_v24  ;;  %2181 = vmatprep.subr.bf16.mxu1 %v2773_v3 }
  0xfa   : > { %814 = vmatpush1.bf16.msra.mxu0 %v2402_v26  ;;  %2182 = vmatpush3.bf16.msra.mxu1 %v2403_v27 }
  0xfb   : > { %815 = vmatprep.subr.bf16.mxu0 %v2404_v28  ;;  %2183 = vmatprep.subr.bf16.mxu1 %v2773_v3 }
  0xfe   : > { %816 = vmatpush1.bf16.msra.mxu0 %v2406_v29  ;;  %2184 = vmatpush3.bf16.msra.mxu1 %v2407_v30 }
  0xff   : > { %2189 = vmatprep.subr.bf16.mxu1 %v2773_v3  ;;  %2213 = vmatprep.subr.bf16.mxu0 %v2773_v3 }
 0x16d   : > { %v596_v9 = vpop.xlane.xlu0 %595 }
 0x16e   : > { %v598_v10 = vmul.f32 0.0078125, %v596_v9 }
 0x170   : > { %v599_v11 = vsub.f32 %v3135_v0, %v598_v10 }
 0x172   : > { %v600_v12 = vmul.f32 %v599_v11, %v599_v11 }
 0x174   : > { %601 = vadd.xlane.f32.xlu0 %v600_v12 }
 0x201   : > { %v602_v31 = vpop.xlane.xlu0 %601 }
 0x202   : > { %v603_v32 = vmul.f32 0.0078125, %v602_v31 }
 0x204   : > { %v604_v33 = vadd.f32 1e-05, %v603_v32 }
 0x206   : > { %2456 = vrsqrt.f32 %v604_v33 }
 0x210   : > { %v2457_v34 = vpop.eup %2456 }
 0x211   : > { %v606_v36 = vmul.f32 %v2457_v34, %v599_v11 }
 0x213   : > { %v614_v38 = vmul.f32 %v2029_v35, %v606_v36 }
 0x215   : > { %v622_v39 = vadd.f32 %v2030_v37, %v614_v38 }
 0x217   : > { %v623_v40 = vpack.c.bf16 %v622_v39, %v622_v39 }
 0x219   : > { %834 = vmatmul.mubr.bf16.vlgmr.msra.gmra.mrb[0].mxu0 %v623_v40  ;;  %2186 = vmatmul.mubr.bf16.vlgmr.msra.gmra.mrb[0].mxu1 %v623_v40 }
 0x21a   : > { %2191 = vmatprep.mubr.msk.bf16.mxu1 %vm2775_vm0, %v2773_v3  ;;  %2215 = vmatprep.mubr.msk.bf16.mxu0 %vm2775_vm0, %v2773_v3 }
 0x2ec   : > { %v835_v48 = vpop.f32.mrb[0].mxu0  ;;  %v876_v49 = vpop.f32.mrb[0].mxu1 }
 0x2ed   : > { %v837_v50 = vpop.f32.mrb[1].mxu0  ;;  %v2187_v51 = vpop.f32.mrb[1].mxu1  ;;  %v877_v60 = vadd.f32 %v876_v49, %v669_v52  ;;  %v836_v62 = vadd.f32 %v835_v48, %v661_v58 }
 0x2ee   : > { %v838_v53 = vadd.f32 %v837_v50, %v665_v46  ;;  %v839_v54 = vpop.f32.mrb[2].mxu0  ;;  %v879_v55 = vpop.f32.mrb[2].mxu1 }
 0x2ef   : > { %v840_v56 = vpop.f32.mrb[3].mxu0  ;;  %v2188_v57 = vpop.f32.mrb[3].mxu1  ;;  %v3168_v63 = vpack.c.bf16 %v877_v60, %v877_v60  ;;  %v882_v1 = vpack.c.bf16 %v836_v62, %v836_v62 }
 0x2f0   : > { %v883_v59 = vpack.c.bf16 %v838_v53, %v838_v53 }
 0x2f1   : > { %v950_v2 = vsel %vm948_vm2, %v3168_v63, 0 }
 0x2f2   : > { %996 = vrot.lane.b32.xlu0 %v883_v59, %s2776_s22  ;;  %v890_v61 = vsel %vm885_vm1, %v883_v59, 0 }
 0x2f3   : > { %2190 = vmatpush3.bf16.xpose.msra.mxu1 %v890_v61 }
 0x2f4   : > { %2195 = vmatprep.subr.bf16.mxu1 %v2773_v3 }
 0x2f6   : > { %1217 = vrot.lane.b32.xlu0 %v883_v59, %s2777_s14 }
 0x2fa   : > { %2192 = vmatmul.mubr.msk.bf16.vlgmr.msra.gmra.mrb[4].mxu1 %vm885_vm1, %v882_v1 }
 0x2fb   : > { %2196 = vmatpush3.bf16.msra.mxu1 %v950_v2  ;;  %2197 = vmatprep.mubr.msk.bf16.mxu1 %vm2775_vm0, %v2773_v3 }
 0x2fc   : > { %2201 = vmatprep.subr.bf16.mxu1 %v2773_v3 }
 0x364   : > { %v997_v16 = vpop.permute.xlu0 %996 }
 0x365   : > { %v1002_v23 = vsel %vm885_vm1, %v997_v16, 0 }
 0x368   : > { %v1218_v21 = vpop.permute.xlu0 %1217 }
 0x369   : > { %v1223_v26 = vsel %vm885_vm1, %v1218_v21, 0  ;;  %v2409_v21 = vld [vmem:[#allocation10 + $0x8] sm:$0xff]  }
 0x3cd   : > { %v926_v4 = vpop.f32.mrb[4].mxu1 }
 0x3ce   : > { %v2193_v5 = vpop.f32.mrb[5].mxu1  ;;  %v933_v6 = vsel %vm932_vm3, %v926_v4, -inf }
 0x3cf   : > { %934 = vmax.xlane.f32.xlu1 %v933_v6  ;;  %v929_v7 = vpop.f32.mrb[6].mxu1 }
 0x3d0   : > { %v2194_v8 = vpop.f32.mrb[7].mxu1 }
 0x45c   : > { %v935_v9 = vpop.xlane.xlu1 %934 }
 0x45d   : > { %v936_v10 = vsub.f32 %v926_v4, %v935_v9 }
 0x45f   : > { %v937_v11 = vmul.f32 1.442695, %v936_v10 }
 0x461   : > { %2458 = vpow2.f32 %v937_v11 }
 0x46b   : > { %v2459_v12 = vpop.eup %2458 }
 0x46c   : > { %v939_v13 = vsel %vm932_vm3, %v2459_v12, 0.0 }
 0x46d   : > { %940 = vadd.xlane.f32.xlu1 %v939_v13 }
 0x47e   : > { %993 = vrot.lane.b32.xlu1 %v882_v1, %s2776_s22 }
 0x482   : > { %1107 = vrot.lane.b32.xlu1 %v883_v59, %s2778_s15 }
 0x486   : > { %1105 = vrot.lane.b32.xlu1 %v882_v1, %s2778_s15 }
 0x48a   : > { %1215 = vrot.lane.b32.xlu1 %v882_v1, %s2777_s14 }
 0x4fa   : > { %v941_v14 = vpop.xlane.xlu1 %940 }
 0x4fb   : > { %2460 = vrcp.f32 %v941_v14 }
 0x4fe   : > { %v994_v15 = vpop.permute.xlu1 %993 }
 0x502   : > { %v1108_v17 = vpop.permute.xlu1 %1107 }
 0x503   : > { %v1113_v18 = vsel %vm885_vm1, %v1108_v17, 0 }
 0x504   : > { %2214 = vmatpush3.bf16.xpose.msra.mxu0 %v1113_v18 }
 0x505   : > { %v2461_v19 = vpop.eup %2460  ;;  %2225 = vmatprep.subr.bf16.mxu0 %v2773_v3 }
 0x506   : > { %v943_v20 = vmul.f32 %v2461_v19, %v2459_v12  ;;  %v1106_v24 = vpop.permute.xlu1 %1105 }
 0x508   : > { %v944_v22 = vpack.c.bf16 %v943_v20, %v943_v20  ;;  %v2408_v20 = vld [vmem:[#allocation10] sm:$0xff]  }
 0x50a   : > { %2198 = vmatmul.mubr.msk.bf16.vlgmr.msra.gmra.mrb[8].mxu1 %vm932_vm3, %v944_v22  ;;  %v1216_v27 = vpop.permute.xlu1 %1215  ;;  %v2410_v22 = vld [vmem:[#allocation10 + $0x10] sm:$0xff]  }
 0x50b   : > { %2202 = vmatpush3.bf16.xpose.msra.mxu1 %v1002_v23  ;;  %2216 = vmatmul.mubr.msk.bf16.vlgmr.msra.gmra.mrb[4].mxu0 %vm885_vm1, %v1106_v24  ;;  %v2411_v23 = vld [vmem:[#allocation10 + $0x18] sm:$0xff]   ;;  %v2412_v24 = vld [vmem:[#allocation10 + $0x20] sm:$0xff]  }
 0x50c   : > { %2226 = vmatpush3.bf16.xpose.msra.mxu0 %v1223_v26  ;;  %2203 = vmatprep.mubr.msk.bf16.mxu1 %vm2775_vm0, %v2773_v3  ;;  %v2414_v26 = vld [vmem:[#allocation10 + $0x30] sm:$0xff]  }
 0x50d   : > { %2227 = vmatprep.mubr.msk.bf16.mxu0 %vm2775_vm0, %v2773_v3  ;;  %2207 = vmatprep.subr.bf16.mxu1 %v2773_v3 }
 0x50e   : > { %2237 = vmatprep.subr.bf16.mxu0 %v2773_v3 }
 0x512   : > { %2204 = vmatmul.mubr.msk.bf16.vlgmr.msra.gmra.mrb[12].mxu1 %vm885_vm1, %v994_v15 }
 0x513   : > { %2228 = vmatmul.mubr.msk.bf16.vlgmr.msra.gmra.mrb[8].mxu0 %vm885_vm1, %v1216_v27  ;;  %2209 = vmatprep.mubr.msk.bf16.mxu1 %vm2775_vm0, %v2773_v3 }
 0x514   : > { %2253 = vmatprep.mubr.msk.bf16.mxu0 %vm2775_vm0, %v2773_v3  ;;  %2238 = vmatpush3.bf16.msra.mxu0 %v2408_v20 }
 0x515   : > { %2239 = vmatprep.subr.bf16.mxu0 %v2773_v3 }
 0x518   : > { %2240 = vmatpush3.bf16.msra.mxu0 %v2409_v21 }
 0x519   : > { %2241 = vmatprep.subr.bf16.mxu0 %v2773_v3 }
 0x51c   : > { %2242 = vmatpush3.bf16.msra.mxu0 %v2410_v22 }
 0x51d   : > { %2243 = vmatprep.subr.bf16.mxu0 %v2773_v3 }
 0x520   : > { %2244 = vmatpush3.bf16.msra.mxu0 %v2411_v23 }
 0x521   : > { %2245 = vmatprep.subr.bf16.mxu0 %v2773_v3 }
 0x524   : > { %2246 = vmatpush3.bf16.msra.mxu0 %v2412_v24 }
 0x525   : > { %2247 = vmatprep.subr.bf16.mxu0 %v2773_v3 }
 0x5dd   : > { %v3201_v28 = vpop.f32.mrb[8].mxu1 }
 0x5de   : > { %v2199_v29 = vpop.f32.mrb[9].mxu1  ;;  %v1149_v30 = vpop.f32.mrb[4].mxu0 }
 0x5df   : > { %v989_v31 = vpop.f32.mrb[10].mxu1  ;;  %v2217_v32 = vpop.f32.mrb[5].mxu0  ;;  %v1155_v33 = vsel %vm932_vm3, %v1149_v30, -inf }
 0x5e0   : > { %1156 = vmax.xlane.f32.xlu1 %v1155_v33  ;;  %v2200_v34 = vpop.f32.mrb[11].mxu1  ;;  %v1152_v35 = vpop.f32.mrb[6].mxu0  ;;  %v2415_v32 = vld [vmem:[#allocation10 + $0x38] sm:$0xff]  }
 0x5e1   : > { %v2218_v36 = vpop.f32.mrb[7].mxu0 }
 0x5e5   : > { %v1038_v37 = vpop.f32.mrb[12].mxu1 }
 0x5e6   : > { %v2205_v38 = vpop.f32.mrb[13].mxu1  ;;  %v1259_v39 = vpop.f32.mrb[8].mxu0  ;;  %v1044_v40 = vsel %vm932_vm3, %v1038_v37, -inf }
 0x5e7   : > { %v2229_v41 = vpop.f32.mrb[9].mxu0  ;;  %1045 = vmax.xlane.f32.xlu0 %v1044_v40  ;;  %v1041_v42 = vpop.f32.mrb[14].mxu1  ;;  %v1265_v48 = vsel %vm932_vm3, %v1259_v39, -inf }
 0x5e8   : > { %v2206_v44 = vpop.f32.mrb[15].mxu1  ;;  %v1262_v45 = vpop.f32.mrb[10].mxu0 }
 0x5e9   : > { %v2230_v46 = vpop.f32.mrb[11].mxu0 }
 0x5eb   : > { %1266 = vmax.xlane.f32.xlu0 %v1265_v48 }
 0x66d   : > { %v1157_v49 = vpop.xlane.xlu1 %1156 }
 0x66e   : > { %v1158_v50 = vsub.f32 %v1149_v30, %v1157_v49  ;;  %v2063_v49 = vld [vmem:[%s3329_s6] ss:$0 sm:$0xff] }
 0x670   : > { %v1159_v51 = vmul.f32 1.442695, %v1158_v50 }
 0x672   : > { %2462 = vpow2.f32 %v1159_v51 }
 0x674   : > { %v1046_v52 = vpop.xlane.xlu0 %1045 }
 0x675   : > { %v1047_v53 = vsub.f32 %v1038_v37, %v1046_v52 }
 0x677   : > { %v1048_v54 = vmul.f32 1.442695, %v1047_v53 }
 0x678   : > { %v1267_v55 = vpop.xlane.xlu0 %1266 }
 0x679   : > { %2464 = vpow2.f32 %v1048_v54  ;;  %v1268_v56 = vsub.f32 %v1259_v39, %v1267_v55 }
 0x67b   : > { %v1269_v57 = vmul.f32 1.442695, %v1268_v56  ;;  %v2418_v56 = vld [vmem:[#allocation11 + $0x4] ss:$8 sps:$4 sm:$0xff]  }
 0x67c   : > { %v2463_v58 = vpop.eup %2462 }
 0x67d   : > { %2466 = vpow2.f32 %v1269_v57  ;;  %v1161_v59 = vsel %vm932_vm3, %v2463_v58, 0.0  ;;  %v2421_v57 = vld [vmem:[#allocation11 + $0x14] ss:$8 sps:$4 sm:$0xff]  }
 0x67e   : > { %1162 = vadd.xlane.f32.xlu0 %v1161_v59  ;;  %v2424_v59 = vld [vmem:[#allocation11 + $0x24] ss:$8 sps:$4 sm:$0xff]  }
 0x683   : > { %v2465_v60 = vpop.eup %2464 }
 0x684   : > { %v1050_v61 = vsel %vm932_vm3, %v2465_v60, 0.0 }
 0x685   : > { %1051 = vadd.xlane.f32.xlu0 %v1050_v61 }
 0x687   : > { %v2467_v62 = vpop.eup %2466 }
 0x688   : > { %v1271_v1 = vsel %vm932_vm3, %v2467_v62, 0.0 }
 0x689   : > { %1272 = vadd.xlane.f32.xlu1 %v1271_v1 }
 0x69a   : > { %1167 = vrot.lane.b32.xlu1 %v3168_v63, %s2778_s15 }
 0x69b   : > { %1057 = vrot.lane.b32.xlu0 %v3168_v63, %s2776_s22 }
 0x69e   : > { %1277 = vrot.lane.b32.xlu1 %v3168_v63, %s2777_s14 }
 0x70b   : > { %v1163_v2 = vpop.xlane.xlu0 %1162 }
 0x712   : > { %v1052_v4 = vpop.xlane.xlu0 %1051 }
 0x713   : > { %2468 = vrcp.f32 %v1052_v4  ;;  %v2425_v4 = vld [vmem:[#allocation11 + $0x30] ss:$8 sps:$4 sm:$0xff]  }
 0x714   : > { %2470 = vrcp.f32 %v1163_v2  ;;  %v2427_v2 = vld [vmem:[#allocation11 + $0x34] ss:$8 sps:$4 sm:$0xff]  }
 0x716   : > { %v1058_v5 = vpop.permute.xlu0 %1057  ;;  %v1273_v7 = vpop.xlane.xlu1 %1272 }
 0x717   : > { %v1063_v6 = vsel %vm948_vm2, %v1058_v5, 0  ;;  %2472 = vrcp.f32 %v1273_v7  ;;  %v2430_v5 = vld [vmem:[#allocation11 + $0x44] ss:$8 sps:$4 sm:$0xff]   ;;  %v2433_v7 = vld [vmem:[#allocation11 + $0x54] ss:$8 sps:$4 sm:$0xff]  }
 0x718   : > { %2208 = vmatpush3.bf16.msra.mxu1 %v1063_v6  ;;  %v2428_v6 = vld [vmem:[#allocation11 + $0x40] ss:$8 sps:$4 sm:$0xff]  }
 0x719   : > { %2219 = vmatprep.subr.bf16.mxu1 %v2773_v3 }
 0x71a   : > { %v1168_v10 = vpop.permute.xlu1 %1167 }
 0x71b   : > { %v1173_v13 = vsel %vm948_vm2, %v1168_v10, 0  ;;  %v2434_v10 = vld [vmem:[#allocation11 + $0x60] ss:$8 sps:$4 sm:$0xff]  }
 0x71d   : > { %v2469_v8 = vpop.eup %2468 }
 0x71e   : > { %v1054_v9 = vmul.f32 %v2469_v8, %v2465_v60  ;;  %v2471_v12 = vpop.eup %2470  ;;  %v1278_v14 = vpop.permute.xlu1 %1277  ;;  %v2422_v60 = vld [vmem:[#allocation11 + $0x20] ss:$8 sps:$4 sm:$0xff]   ;;  %v2431_v8 = vld [vmem:[#allocation11 + $0x50] ss:$8 sps:$4 sm:$0xff]  }
 0x71f   : > { %v1165_v63 = vmul.f32 %v2471_v12, %v2463_v58  ;;  %v1283_v17 = vsel %vm948_vm2, %v1278_v14, 0  ;;  %v2419_v58 = vld [vmem:[#allocation11 + $0x10] ss:$8 sps:$4 sm:$0xff]  }
 0x720   : > { %v1055_v11 = vpack.c.bf16 %v1054_v9, %v1054_v9  ;;  %v2436_v9 = vld [vmem:[#allocation11 + $0x64] ss:$8 sps:$4 sm:$0xff]   ;;  %v2437_v12 = vld [vmem:[#allocation11 + $0x70] ss:$8 sps:$4 sm:$0xff]  }
 0x721   : > { %v1166_v15 = vpack.c.bf16 %v1165_v63, %v1165_v63  ;;  %v2473_v16 = vpop.eup %2472 }
 0x722   : > { %2210 = vmatmul.mubr.msk.bf16.vlgmr.msra.gmra.mrb[16].mxu1 %vm932_vm3, %v1055_v11  ;;  %v1275_v18 = vmul.f32 %v2473_v16, %v2467_v62  ;;  %v2439_v11 = vld [vmem:[#allocation11 + $0x74] ss:$8 sps:$4 sm:$0xff]   ;;  %v2072_v16 = vld [vmem:[%s3370_s29] ss:$0 sm:$0xff] }
 0x723   : > { %2220 = vmatpush3.bf16.msra.mxu1 %v1173_v13  ;;  %2221 = vmatprep.mubr.msk.bf16.mxu1 %vm2775_vm0, %v2773_v3 }
 0x724   : > { %2231 = vmatprep.subr.bf16.mxu1 %v2773_v3  ;;  %v1276_v19 = vpack.c.bf16 %v1275_v18, %v1275_v18  ;;  %v2073_v18 = vld [vmem:[%s3371_s1] ss:$0 sm:$0xff]  ;;  %s2110_s1 = sshll.u32 %s2881_s24, 7  ;;  %s2779_s24 = smov [#allocation14]  }
 0x725   : > { %s2684_s8 = sshll.u32 %s2779_s24, 4  ;;  %s2685_s8 = int_to_ptr.vmem [resolvable:$false] %s2684_s8 }
 0x726   : > { %p2687_p1 = scmp.lt.s32.totalorder %s3281_s17, %s2685_s8 }
 0x72a   : > { %2222 = vmatmul.mubr.msk.bf16.vlgmr.msra.gmra.mrb[20].mxu1 %vm932_vm3, %v1166_v15 }
 0x72b   : > { %2232 = vmatpush3.bf16.msra.mxu1 %v1283_v17  ;;  %2233 = vmatprep.mubr.msk.bf16.mxu1 %vm2775_vm0, %v2773_v3 }
 0x72c   : > { %1591 = vmatprep.subr.bf16.mxu1 %v2418_v56  ;;  %v2455_v56 = vld [vmem:[#allocation13 + $0x38] sm:$0xff]  }
 0x732   : > { %2234 = vmatmul.mubr.msk.bf16.vlgmr.msra.gmra.mrb[24].mxu1 %vm932_vm3, %v1276_v19 }
 0x733   : > { %1623 = vmatprep.mubr.bf16.mxu1 %v2774_v25  ;;  %v2413_v25 = vld [vmem:[#allocation10 + $0x28] sm:$0xff]  }
 0x734   : > { %2248 = vmatpush3.bf16.msra.mxu0 %v2413_v25 }
 0x735   : > { %2249 = vmatprep.subr.bf16.mxu0 %v2773_v3 }
 0x738   : > { %2250 = vmatpush3.bf16.msra.mxu0 %v2414_v26 }
 0x739   : > { %2251 = vmatprep.subr.bf16.mxu0 %v2773_v3 }
 0x73c   : > { %2252 = vmatpush3.bf16.msra.mxu0 %v2415_v32 }
 0x7f5   : > { %v1099_v27 = vpop.f32.mrb[16].mxu1 }
 0x7f6   : > { %1326 = vrot.lane.b32.xlu1 %v1099_v27, %s2777_s14  ;;  %v2211_v29 = vpop.f32.mrb[17].mxu1 }
 0x7f7   : > { %v1102_v30 = vpop.f32.mrb[18].mxu1 }
 0x7f8   : > { %v2212_v31 = vpop.f32.mrb[19].mxu1 }
 0x7fd   : > { %v1209_v33 = vpop.f32.mrb[20].mxu1 }
 0x7fe   : > { %1330 = vrot.lane.b32.xlu0 %v1209_v33, %s2778_s15  ;;  %v2223_v34 = vpop.f32.mrb[21].mxu1  ;;  %s3376_s15 = sld [smem:[#allocation28_spill]] }
 0x7ff   : > { %v1212_v35 = vpop.f32.mrb[22].mxu1 }
 0x800   : > { %v2224_v36 = vpop.f32.mrb[23].mxu1 }
 0x805   : > { %v1319_v37 = vpop.f32.mrb[24].mxu1 }
 0x806   : > { %1334 = vrot.lane.b32.xlu1 %v1319_v37, %s2776_s22  ;;  %v2235_v38 = vpop.f32.mrb[25].mxu1  ;;  %s3372_s22 = sld [smem:[#allocation24_spill]] }
 0x807   : > { %v1322_v39 = vpop.f32.mrb[26].mxu1 }
 0x808   : > { %v2236_v40 = vpop.f32.mrb[27].mxu1 }
 0x809   : > { %v2440_v40 = vld [vmem:[#allocation13 + $0x40] sm:$0xff]  }
 0x80a   : > { %2147 = vmatprep.subr.bf16.mxu0 %v2440_v40 }
 0x80c   : > { %v1499_v22 = vld [vmem:[%s3372_s22] sm:$0x3] }
 0x80d   : > { %v1504_v23 = vrot.slane %v1499_v22, %v3162_v47  ;;  %v1508_v24 = vrot.slane %v1499_v22, %v3156_v43 }
 0x868   : > { %v1327_v41 = vpop.permute.xlu1 %1326 }
 0x869   : > { %v1337_v3 = vsel %vm885_vm1, %v3201_v28, %v1327_v41  ;;  %v2416_v28 = vld [vmem:[#allocation11] ss:$8 sps:$4 sm:$0xff]  }
 0x86a   : > { %1592 = vmatpush1.bf16.msra.mxu1 %v2416_v28  ;;  %v2441_v41 = vld [vmem:[#allocation13] sm:$0xff]   ;;  %v2454_v28 = vld [vmem:[#allocation13 + $0x78] sm:$0xff]  }
 0x86b   : > { %1593 = vmatprep.subr.bf16.mxu1 %v2421_v57 }
 0x86e   : > { %1594 = vmatpush1.bf16.msra.mxu1 %v2419_v58 }
 0x86f   : > { %1595 = vmatprep.subr.bf16.mxu1 %v2424_v59 }
 0x870   : > { %v1331_v42 = vpop.permute.xlu0 %1330 }
 0x871   : > { %v1339_v44 = vsel %vm1338_vm4, %v1337_v3, %v1331_v42  ;;  %v2442_v42 = vld [vmem:[#allocation13 + $0x48] sm:$0xff]  }
 0x872   : > { %1596 = vmatpush1.bf16.msra.mxu1 %v2422_v60  ;;  %v2443_v3 = vld [vmem:[#allocation13 + $0x8] sm:$0xff]  }
 0x873   : > { %1597 = vmatprep.subr.bf16.mxu1 %v2427_v2  ;;  %v1649_v60 = vld [vmem:[%s3373_s26] sm:$0x3]  ;;  %s3279_s26 = scalar_lea.hbm %s3376_s15, %s2110_s1 }
 0x876   : > { %1598 = vmatpush1.bf16.msra.mxu1 %v2425_v4 }
 0x877   : > { %1599 = vmatprep.subr.bf16.mxu1 %v2430_v5 }
 0x878   : > { %v1335_v45 = vpop.permute.xlu1 %1334 }
 0x879   : > { %v1341_v46 = vsel %vm1340_vm5, %v1339_v44, %v1335_v45  ;;  %v2444_v44 = vld [vmem:[#allocation13 + $0x50] sm:$0xff]  }
 0x87a   : > { %v1342_v48 = vpack.c.bf16 %v1341_v46, %v1341_v46  ;;  %1600 = vmatpush1.bf16.msra.mxu1 %v2428_v6  ;;  %v2445_v45 = vld [vmem:[#allocation13 + $0x10] sm:$0xff]   ;;  %v2446_v46 = vld [vmem:[#allocation13 + $0x58] sm:$0xff]  }
 0x87b   : > { %1601 = vmatprep.subr.bf16.mxu1 %v2433_v7 }
 0x87c   : > { %2254 = vmatmul.mubr.bf16.vlgmr.msra.gmra.mrb[12].mxu0 %v1342_v48  ;;  %v2447_v48 = vld [vmem:[#allocation13 + $0x18] sm:$0xff]  }
 0x87d   : > { %2148 = vmatpush3.bf16.msra.mxu0 %v2441_v41 }
 0x87e   : > { %1602 = vmatpush1.bf16.msra.mxu1 %v2431_v8  ;;  %2149 = vmatprep.subr.bf16.mxu0 %v2442_v42 }
 0x87f   : > { %1603 = vmatprep.subr.bf16.mxu1 %v2436_v9 }
 0x881   : > { %2150 = vmatpush3.bf16.msra.mxu0 %v2443_v3 }
 0x882   : > { %1604 = vmatpush1.bf16.msra.mxu1 %v2434_v10  ;;  %2151 = vmatprep.subr.bf16.mxu0 %v2444_v44 }
 0x883   : > { %1605 = vmatprep.subr.bf16.mxu1 %v2439_v11 }
 0x885   : > { %2152 = vmatpush3.bf16.msra.mxu0 %v2445_v45 }
 0x886   : > { %1606 = vmatpush1.bf16.msra.mxu1 %v2437_v12  ;;  %2153 = vmatprep.subr.bf16.mxu0 %v2446_v46 }
 0x889   : > { %2154 = vmatpush3.bf16.msra.mxu0 %v2447_v48 }
 0x94f   : > { %v1448_v50 = vpop.f32.mrb[12].mxu0 }
 0x950   : > { %v1449_v51 = vadd.f32 %v2063_v49, %v1448_v50  ;;  %v2255_v52 = vpop.f32.mrb[13].mxu0  ;;  %v2448_v49 = vld [vmem:[#allocation13 + $0x60] sm:$0xff]  }
 0x951   : > { %v1451_v53 = vpop.f32.mrb[14].mxu0  ;;  %v2449_v50 = vld [vmem:[#allocation13 + $0x20] sm:$0xff]   ;;  %2155 = vmatprep.subr.bf16.mxu0 %v2448_v49  ;;  %v2451_v52 = vld [vmem:[#allocation13 + $0x28] sm:$0xff]  }
 0x952   : > { %v3244_v54 = vadd.f32 %v1449_v51, %v3135_v0  ;;  %v2256_v55 = vpop.f32.mrb[15].mxu0  ;;  %v2450_v51 = vld [vmem:[#allocation13 + $0x68] sm:$0xff]   ;;  %2156 = vmatpush3.bf16.msra.mxu0 %v2449_v50  ;;  %v2452_v53 = vld [vmem:[#allocation13 + $0x70] sm:$0xff]  }
 0x953   : > { %2157 = vmatprep.subr.bf16.mxu0 %v2450_v51  ;;  %v2453_v55 = vld [vmem:[#allocation13 + $0x30] sm:$0xff]  }
 0x954   : > { %1455 = vadd.xlane.f32.xlu0 %v3244_v54 }
 0x956   : > { %2158 = vmatpush3.bf16.msra.mxu0 %v2451_v52 }
 0x957   : > { %2159 = vmatprep.subr.bf16.mxu0 %v2452_v53 }
 0x95a   : > { %2160 = vmatpush3.bf16.msra.mxu0 %v2453_v55 }
 0x95b   : > { %2161 = vmatprep.subr.bf16.mxu0 %v2454_v28 }
 0x95e   : > { %2162 = vmatpush3.bf16.msra.mxu0 %v2455_v56 }
 0x9e1   : > { %v1456_v61 = vpop.xlane.xlu0 %1455 }
 0x9e2   : > { %v1457_v62 = vmul.f32 0.0078125, %v1456_v61  ;;  %v1663_v61 = vld [vmem:[%s3374_s16] sm:$0x3]  ;;  %s2686_s16 = scalar_lea.vmem %s2685_s8, 256 }
 0x9e3   : > { %v1668_v5 = vrot.slane %v1663_v61, %v3162_v47  ;;  %v1672_v6 = vrot.slane %v1663_v61, %v3156_v43  ;;  %p2688_p3 = scmp.lt.s32.totalorder %s2686_s16, %s2680_s23 }
 0x9e4   : > { %v1458_v0 = vsub.f32 %v3244_v54, %v1457_v62  ;;  %v1654_v62 = vrot.slane %v1649_v60, %v3162_v47 }
 0x9e5   : > { %p2689_p2 = por %p2688_p3, %p2687_p1 }
 0x9e6   : > { %v1459_v1 = vmul.f32 %v1458_v0, %v1458_v0 }
 0x9e7   : > { %p2690_p0 = pnand %p2689_p2, %p2683_p13 }
 0x9e8   : > { %1460 = vadd.xlane.f32.xlu1 %v1459_v1 }
 0xa75   : > { %v1461_v13 = vpop.xlane.xlu1 %1460 }
 0xa76   : > { %v1462_v63 = vmul.f32 0.0078125, %v1461_v13 }
 0xa78   : > { %v1463_v14 = vadd.f32 1e-05, %v1462_v63 }
 0xa7a   : > { %2474 = vrsqrt.f32 %v1463_v14 }
 0xa84   : > { %v2475_v15 = vpop.eup %2474 }
 0xa85   : > { %v1465_v17 = vmul.f32 %v2475_v15, %v1458_v0  ;;  %v1658_v0 = vrot.slane %v1649_v60, %v3156_v43 }
 0xa87   : > { %v1473_v19 = vmul.f32 %v2072_v16, %v1465_v17 }
 0xa89   : > { %v1481_v20 = vadd.f32 %v2073_v18, %v1473_v19 }
 0xa8b   : > { %v1482_v21 = vpack.c.bf16 %v1481_v20, %v1481_v20 }
 0xa8d   : > { %1624 = vmatmul.mubr.bf16.vlgmr.msra.gmra.mrb[28].mxu1 %v1482_v21  ;;  %v2092_v21 = vld [vmem:[%s3375_s11] ss:$0 sm:$0xff] }
 0xb60   : > { %v1625_v25 = vpop.f32.mrb[28].mxu1 }
 0xb61   : > { %v1626_v26 = vadd.f32 %v1625_v25, %v1504_v23  ;;  %v1627_v27 = vpop.f32.mrb[29].mxu1 }
 0xb62   : > { %v1628_v29 = vadd.f32 %v1627_v27, %v1508_v24  ;;  %v1629_v30 = vpop.f32.mrb[30].mxu1 }
 0xb63   : > { %v1630_v31 = vpop.f32.mrb[31].mxu1 }
 0xb64   : > { %v1632_v32 = vadd.f32 %v1628_v29, %v1626_v26 }
 0xb66   : > { %1633 = vadd.xlane.f32.xlu0 %v1632_v32 }
 0xbf3   : > { %v1634_v33 = vpop.xlane.xlu0 %1633 }
 0xbf4   : > { %v1636_v34 = vmul.f32 0.00390625, %v1634_v33 }
 0xbf6   : > { %v1637_v35 = vsub.f32 %v1626_v26, %v1636_v34  ;;  %v1638_v36 = vsub.f32 %v1628_v29, %v1636_v34 }
 0xbf8   : > { %v1639_v37 = vmul.f32 %v1637_v35, %v1637_v35  ;;  %v1640_v38 = vmul.f32 %v1638_v36, %v1638_v36 }
 0xbfa   : > { %v1641_v39 = vadd.f32 %v1640_v38, %v1639_v37 }
 0xbfc   : > { %1642 = vadd.xlane.f32.xlu0 %v1641_v39 }
 0xc89   : > { %v1643_v57 = vpop.xlane.xlu0 %1642 }
 0xc8a   : > { %v1644_v58 = vmul.f32 0.00390625, %v1643_v57 }
 0xc8c   : > { %v1645_v59 = vadd.f32 1e-05, %v1644_v58 }
 0xc8e   : > { %2476 = vrsqrt.f32 %v1645_v59 }
 0xc98   : > { %v2477_v1 = vpop.eup %2476 }
 0xc99   : > { %v1647_v2 = vmul.f32 %v2477_v1, %v1637_v35  ;;  %v1648_v4 = vmul.f32 %v2477_v1, %v1638_v36 }
 0xc9b   : > { %v1661_v7 = vmul.f32 %v1654_v62, %v1647_v2  ;;  %v1662_v8 = vmul.f32 %v1658_v0, %v1648_v4 }
 0xc9d   : > { %v1676_v9 = vadd.f32 %v1672_v6, %v1662_v8  ;;  %v1675_v10 = vadd.f32 %v1668_v5, %v1661_v7 }
 0xc9f   : > { %v1680_v11 = vmin.f32 %v1676_v9, 0.0  ;;  %v1679_v12 = vmin.f32 %v1675_v10, 0.0  ;;  %vm1678_vm6 = vcmp.gt.f32.partialorder %v1676_v9, 0.0  ;;  %vm1677_vm7 = vcmp.gt.f32.partialorder %v1675_v10, 0.0 }
 0xca1   : > { %v1683_v13 = vmul.f32 1.442695, %v1680_v11  ;;  %v1681_v63 = vmul.f32 1.442695, %v1679_v12 }
 0xca3   : > { %2478 = vpow2.f32 %v1683_v13 }
 0xca4   : > { %2480 = vpow2.f32 %v1681_v63 }
 0xcad   : > { %v2479_v14 = vpop.eup %2478 }
 0xcae   : > { %v2481_v15 = vpop.eup %2480  ;;  %v2091_v16 = vadd.f32 -1.0, %v2479_v14 }
 0xcaf   : > { %v2090_v17 = vadd.f32 -1.0, %v2481_v15 }
 0xcb0   : > { %v1688_v47 = vsel %vm1678_vm6, %v1676_v9, %v2091_v16 }
 0xcb1   : > { %v1690_v43 = vpack.c.bf16 %v1688_v47, %v1688_v47  ;;  %v1687_v18 = vsel %vm1677_vm7, %v1675_v10, %v2090_v17 }
 0xcb2   : > { %v1689_v19 = vpack.c.bf16 %v1687_v18, %v1687_v18 }
 0xcb3   : > { %1858 = vmatprep.mubr.bf16.mxu0 %v1690_v43 }
 0xcb4   : > { %1859 = vmatmul.mubr.bf16.vlgmr.msra.gmra.mrb[16].mxu0 %v1689_v19 }
 0xd87   : > { %v2163_v20 = vpop.f32.mrb[16].mxu0 }
 0xd88   : > { %v2164_v22 = vpop.f32.mrb[17].mxu0 }
 0xd89   : > { %v2165_v23 = vadd.f32 %v2164_v22, %v2163_v20  ;;  %v2166_v24 = vpop.f32.mrb[18].mxu0 }
 0xd8a   : > { %v2167_v25 = vpop.f32.mrb[19].mxu0 }
 0xd8b   : > { %v1861_v26 = vadd.f32 %v2165_v23, %v2092_v21 }
 0xd8d   : > { %v1866_v27 = vadd.f32 %v1861_v26, %v3244_v54 }
 0xd8f   : > { %1867 = vst [vmem:[%s592_s25] sm:$0xff] %v1866_v27 }
 0xd90   : > { %2693 = shalt.err (!%p2690_p0)
}
 0xd91   : > { %s2694_s27 = scalar_lea.hbm %s3279_s26, 128  ;;  %s2698_s11 = scalar_lea.hbm %s3376_s15, 256 }
 0xd92   : > { %p2695_p10 = scmp.ne.s32.totalorder %s3279_s26, %s2694_s27  ;;  %p2699_p8 = scmp.lt.u32.totalorder %s3279_s26, %s3376_s15 }
 0xd93   : > { %p2700_p5 = scmp.lt.u32.totalorder %s2698_s11, %s2694_s27  ;;  %p2702_p6 = scmp.lt.u32.totalorder %s2694_s27, %s3279_s26 }
 0xd94   : > { %p2696_p11 = pnand %p2695_p10, %p3377_p9 }
 0xd95   : > { %p2701_p7 = por %p2700_p5, %p2699_p8 }
 0xd96   : > { %p2697_p12 = pneg %p2696_p11 }
 0xd97   : > { %p2703_p4 = por %p2702_p6, %p2701_p7 }
 0xd99   : > { %p2704_p13 = pnand %p2703_p4, %p2697_p12 }
 0xd9b   : > { %2707 = shalt.err (!%p2704_p13)
}
 0xd9c   : > { %2283 = dma.vmem_to_hbm [thread:$0]  (%p3377_p9), %s3281_s17, 128, %s3279_s26, %s1869_s12  }
 0xd9d PF: > { %s1894_s22 = sand.u32 1, %s2746_s18   ;;  %p3378_p1 = scmp.ne.s32.totalorder %s3361_s7, 0 }
 0xd9e   : > { %p3379_p3 = scmp.ge.s32.totalorder %s2758_s21, 2  ;;  %s1895_s14 = scalar_lea.sflag [#allocation4], %s1894_s22 }
 0xda0   : > { %p2309_p2 = pnand %p3379_p3, %p3378_p1 }
 0xda2   : > { %2741 = dma.done.wait (!%p2309_p2), %s1895_s14, 128  }
 0xda3   : > { %2743 = vsyncadd (!%p2309_p2), %s1895_s14, 4294967168  ;;  %p31_p0 = scmp.ge.s32.totalorder %s3037_s28, 4   ;;  %s3380_s18 = smov %s2750_s19 }
 0xda4   : > { %s3381_s19 = smov %s2754_s20  ;;  %s3382_s20 = smov %s3048_s10 }
 0xda5   : > { %s3383_s21 = smov %s3037_s28  ;;  %33 = sbr.rel (!%p31_p0) target bundleno = 18 (0x12), region = 149 }
 0xdac   :  { %1900 = vsyncpa [#allocation3], 1 }
 0xdad   :  { %1902 = vsyncpa [#allocation3 + $0x1], 1 }
 0xdae   :  { %1903 = vsyncpa [#allocation6], 1 }
 0xdaf   :  { %1904 = vsyncpa [#allocation9], 1 }
 0xdb0   :  { %1905 = vsyncpa [#allocation12], 1 }
 0xdb1   :  { %1906 = vsyncpa [#allocation4], 1 }
 0xdb2   :  { %1908 = vsyncpa [#allocation4 + $0x1], 1 }

</bundles_post_ra>
